<compile_context>
chip_gen: v7x
topology: tpu7x:2x2x1
jax: 0.10.0
libtpu: 0.0.40
codegen_flags: <defaults>
</compile_context>

<pallas_src>
import functools

import jax
import jax.numpy as jnp
from jax.experimental import pallas as pl
from jax.experimental.pallas import tpu as pltpu


# ---------------------------------------------------------------------------
# small static tiling helpers (trace-time Python ints only)
# ---------------------------------------------------------------------------
def _round_up(x, m):
    return (x + m - 1) // m * m


def _row_tile(nrows, cap=64):
    """Sublane-friendly row tile: multiple of 8 dividing nrows, or full extent."""
    if nrows <= cap:
        return nrows
    if nrows % 8 == 0:
        t = (cap // 8) * 8
        while t >= 8:
            if nrows % t == 0:
                return t
            t -= 8
    return nrows


def _col_tile(ncols, cap=4096):
    """Lane-friendly column tile: multiple of 128 dividing ncols, or full extent."""
    if ncols <= cap:
        return ncols
    if ncols % 128 == 0:
        t = (cap // 128) * 128
        while t >= 128:
            if ncols % t == 0:
                return t
            t -= 128
    return ncols


_VMEM_LIMIT = 48 * 1024 * 1024   # < 64 MiB physical on v7x, > default scoped limit


# ---------------------------------------------------------------------------
# Kernel 1: fused BatchNorm3d (eval) + LeakyReLU(0.1) + MaxPool3d(2)
#   xw_ref block: (8, RC, TP) bf16  -- 8 pool-window co-sets, RC rows, TP pooled cols
#   o_ref  block: (RC, TP) bf16
# ---------------------------------------------------------------------------
def _bn_lrelu_pool_kernel(scale_ref, shift_ref, xw_ref, o_ref, *, neg_slope):
    sc = scale_ref[...]                       # (RC, 1) per-row BN scale (f32)

    # MaxPool3d(2): elementwise maxima over the 8 window co-sets on SCALED
    # values (scale may be negative, so it cannot be hoisted past the max).
    # bf16 co-sets are upcast to f32 in-register (v5e VPU has no bf16 math).
    m = xw_ref[0].astype(jnp.float32) * sc
    for w in range(1, 8):
        m = jnp.maximum(m, xw_ref[w].astype(jnp.float32) * sc)

    # BN shift + LeakyReLU hoisted out of the 8-way loop (exact: +const and a
    # monotone pointwise fn commute with max); leaky as a single max since
    # 0 < neg_slope < 1.
    m = m + shift_ref[...]
    o_ref[...] = jnp.maximum(m, neg_slope * m).astype(o_ref.dtype)


def bn_lrelu_pool(x, gamma, beta, mean, var, eps=1e-5, neg_slope=0.1):
    N, C, D, H, W = x.shape
    assert D % 2 == 0 and H % 2 == 0 and W % 2 == 0, "MaxPool3d(2) needs even dims"
    Do, Ho, Wo = D // 2, H // 2, W // 2
    NC, P = N * C, Do * Ho * Wo

    scale = (gamma / jnp.sqrt(var + eps)).astype(jnp.float32)
    shift = (beta - mean * scale).astype(jnp.float32)
    scale_rows = jnp.tile(scale, (N,)).reshape(NC, 1)     # row (n*C+c) -> channel c
    shift_rows = jnp.tile(shift, (N,)).reshape(NC, 1)

    # Co-set-major pool-window layout: xw[w, n*C+c, p] is element w (= d0*4+h0*2+w0)
    # of the 2x2x2 window of pooled position p.  Emitted directly in bf16 so the
    # XLA-side rearrangement writes (and the kernel re-reads) half the bytes.
    # TODO(synk): an in-kernel window gather from native NCDHW would remove this
    # extra HBM pass entirely.
    xw = x.reshape(N, C, Do, 2, Ho, 2, Wo, 2)
    xw = xw.transpose(3, 5, 7, 0, 1, 2, 4, 6).reshape(8, NC, P).astype(jnp.bfloat16)

    RC = _row_tile(NC, cap=64)        # bigger tiles: >= 1 MiB per step when possible
    TP = _col_tile(P, cap=4096)

    out = pl.pallas_call(
        functools.partial(_bn_lrelu_pool_kernel, neg_slope=neg_slope),
        out_shape=jax.ShapeDtypeStruct((NC, P), jnp.bfloat16),
        grid=(NC // RC, P // TP),
        in_specs=[
            pl.BlockSpec((RC, 1), lambda i, j: (i, 0)),          # scale rows
            pl.BlockSpec((RC, 1), lambda i, j: (i, 0)),          # shift rows
            pl.BlockSpec((8, RC, TP), lambda i, j: (0, i, j)),   # window co-sets
        ],
        out_specs=pl.BlockSpec((RC, TP), lambda i, j: (i, j)),
        compiler_params=pltpu.CompilerParams(
            dimension_semantics=("parallel", "parallel"),
            vmem_limit_bytes=_VMEM_LIMIT),
    )(scale_rows, shift_rows, xw)
    return out.reshape(N, C, Do, Ho, Wo)          # bf16 pooled activation


# ---------------------------------------------------------------------------
# Kernel 2: CondConv3D (3x3x3, pad=1) as routing-mixed im2col matmul
#   out[n] (OCp, P) = (sum_e r[n,e] W_e) (OCp, Kp) @ patches[n] (Kp, P) + b_mix
# w_mix/b_mix are computed once per sample into VMEM scratch and reused for
# every P tile; one bf16 MXU matmul per (OCp, TP) output tile, f32 accumulation.
# ---------------------------------------------------------------------------
def _condconv_kernel(r_ref, p_ref, w_ref, b_ref, o_ref, wmix_ref, bmix_ref,
                     *, num_experts):
    n = pl.program_id(0)

    # Expert mix hoisted out of the P-tile loop: the inner grid axis is
    # "arbitrary", so j == 0 always runs first for each sample on a core.
    @pl.when(pl.program_id(1) == 0)
    def _():
        w_mix = r_ref[n, 0] * w_ref[0].astype(jnp.float32)     # (OCp, Kp) f32
        b_mix = r_ref[n, 0] * b_ref[0]                         # (OCp, 1)  f32
        for e in range(1, num_experts):                        # static, tiny E
            w_mix = w_mix + r_ref[n, e] * w_ref[e].astype(jnp.float32)
            b_mix = b_mix + r_ref[n, e] * b_ref[e]
        wmix_ref[...] = w_mix.astype(jnp.bfloat16)
        bmix_ref[...] = b_mix

    acc = jnp.dot(wmix_ref[...], p_ref[...],
                  preferred_element_type=jnp.float32)          # (OCp, TP) f32 acc
    o_ref[...] = (acc + bmix_ref[...]).astype(o_ref.dtype)


def condconv3d_kp(patches_kp, routing, w_oc_k, b_oc, *, lane_tile=1024):
    """patches_kp: (N, Kp, Pp) bf16 (K-major im2col, zero padded);
       routing: (N, E); w_oc_k: (E, OC, K); b_oc: (E, OC)."""
    N, Kp, Pp = patches_kp.shape
    E, OC, K = w_oc_k.shape

    OCp = _round_up(OC, 128)                  # lane-dense, MXU-aligned channels
    TP = _col_tile(Pp, cap=lane_tile)         # wide lane tile feeds 256-wide MXUs

    w_p = jnp.pad(w_oc_k, ((0, 0), (0, OCp - OC), (0, Kp - K))).astype(jnp.bfloat16)
    b_p = jnp.pad(b_oc, ((0, 0), (0, OCp - OC))).reshape(E, OCp, 1).astype(jnp.float32)
    routing = routing.astype(jnp.float32)

    out = pl.pallas_call(
        functools.partial(_condconv_kernel, num_experts=E),
        out_shape=jax.ShapeDtypeStruct((N, OCp, Pp), jnp.float32),
        grid=(N, Pp // TP),
        in_specs=[
            pl.BlockSpec(memory_space=pltpu.MemorySpace.SMEM),        # routing (N, E)
            pl.BlockSpec((None, Kp, TP), lambda n, j: (n, 0, j)),     # patch lanes
            pl.BlockSpec((E, OCp, Kp), lambda n, j: (0, 0, 0)),       # weights (resident, bf16)
            pl.BlockSpec((E, OCp, 1), lambda n, j: (0, 0, 0)),        # biases  (resident)
        ],
        out_specs=pl.BlockSpec((None, OCp, TP), lambda n, j: (n, 0, j)),
        scratch_shapes=[pltpu.VMEM((OCp, Kp), jnp.bfloat16),          # mixed kernel
                        pltpu.VMEM((OCp, 1), jnp.float32)],           # mixed bias
        compiler_params=pltpu.CompilerParams(
            dimension_semantics=("parallel", "arbitrary"),            # N parallel (v7x 2 TCs)
            vmem_limit_bytes=_VMEM_LIMIT),
    )(routing, patches_kp, w_p, b_p)
    return out                                     # (N, OCp, Pp) f32, channel-major


# ---------------------------------------------------------------------------
# Glue: im2col patch extraction for 3x3x3, stride 1, padding 1 (plain JAX)
# ---------------------------------------------------------------------------
def im2col_3x3x3_pad1_kp(x, Kp, Pp):
    # x: (N, C, D, H, W) bf16 -> (N, Kp, Pp) bf16 in its NATURAL K-major layout
    # (K ordered (c, kd, kh, kw)); single pass, padding fused, no transpose and
    # no second pad/cast copy.
    # TODO(synk): this still materializes a 27x patch tensor in HBM; an
    # implicit-GEMM conv kernel would cut that traffic to ~1x.
    N, C, D, H, W = x.shape
    xp = jnp.pad(x, ((0, 0), (0, 0), (1, 1), (1, 1), (1, 1)))
    slabs = [xp[:, :, kd:kd + D, kh:kh + H, kw:kw + W]
             for kd in range(3) for kh in range(3) for kw in range(3)]
    s = jnp.stack(slabs, axis=2)                       # (N, C, 27, D, H, W)
    pk = s.reshape(N, C * 27, D * H * W)               # (N, K, P)
    return jnp.pad(pk, ((0, 0), (0, Kp - C * 27), (0, Pp - D * H * W)))


def im2col_3x3x3_pad1(x):
    # (N, P, K) row-major variant, used only by the pure-JAX reference.
    N, C, D, H, W = x.shape
    xp = jnp.pad(x, ((0, 0), (0, 0), (1, 1), (1, 1), (1, 1)))
    slabs = [xp[:, :, kd:kd + D, kh:kh + H, kw:kw + W]
             for kd in range(3) for kh in range(3) for kw in range(3)]
    s = jnp.stack(slabs, axis=2)                       # (N, C, 27, D, H, W)
    return s.reshape(N, C * 27, D * H * W).transpose(0, 2, 1)


# ---------------------------------------------------------------------------
# Full forward of single_conv_down
# ---------------------------------------------------------------------------
def single_conv_down_forward(params, x, embedding):
    # feed: BatchNorm3d (inference) -> LeakyReLU(0.1) -> MaxPool3d(2)
    xp = bn_lrelu_pool(x, params["bn_gamma"], params["bn_beta"],
                       params["bn_mean"], params["bn_var"])       # bf16 pooled

    # CondConv3D routing: sigmoid(Linear(embedding)) per sample.
    # TODO(synk): CondConv3D source not provided; using canonical CondConv routing
    # (Linear -> sigmoid -> per-sample expert kernel mixing). Routing dropout is
    # identity at inference.
    logits = embedding @ params["route_w"].T + params["route_b"]   # (N, E)
    routing = jax.nn.sigmoid(logits)

    N, C, Do, Ho, Wo = xp.shape
    E, OC = params["conv_b"].shape
    K, P = C * 27, Do * Ho * Wo
    Kp, Pp = _round_up(K, 128), _round_up(P, 128)

    patches = im2col_3x3x3_pad1_kp(xp, Kp, Pp)                     # (N, Kp, Pp) bf16
    w = params["conv_w"].reshape(E, OC, K)                         # (E, OC, K)

    out = condconv3d_kp(patches, routing, w, params["conv_b"])     # (N, OCp, Pp)
    # channel-major kernel output -> NCDHW is slice-only (no transpose pass)
    return out[:, :OC, :P].reshape(N, OC, Do, Ho, Wo)


# ---------------------------------------------------------------------------
# Pure-JAX reference (f32) for a loose sanity check
# ---------------------------------------------------------------------------
def reference_forward(params, x, embedding):
    scale = params["bn_gamma"] / jnp.sqrt(params["bn_var"] + 1e-5)
    shift = params["bn_beta"] - params["bn_mean"] * scale
    y = x * scale[None, :, None, None, None] + shift[None, :, None, None, None]
    y = jnp.where(y >= 0, y, 0.1 * y)
    N, C, D, H, W = y.shape
    Do, Ho, Wo = D // 2, H // 2, W // 2
    y = y.reshape(N, C, Do, 2, Ho, 2, Wo, 2).max(axis=(3, 5, 7))
    r = jax.nn.sigmoid(embedding @ params["route_w"].T + params["route_b"])
    E, OC = params["conv_b"].shape
    K = C * 27
    pat = im2col_3x3x3_pad1(y)                                 # (N, P, K)
    w = params["conv_w"].reshape(E, OC, K)                     # (E, OC, K)
    wmix = jnp.einsum("ne,eok->nok", r, w)
    bmix = r @ params["conv_b"]                                # (N, OC)
    out = jnp.einsum("npk,nok->nop", pat, wmix) + bmix[:, :, None]
    return out.reshape(N, OC, Do, Ho, Wo)


# ---------------------------------------------------------------------------
# Deterministic parameter init (synthetic; no checkpoint loading)
# ---------------------------------------------------------------------------
def init_params(key, in_ch, out_ch, num_experts, embeddings):
    ks = jax.random.split(key, 7)
    fan = in_ch * 27 + out_ch
    return dict(
        bn_gamma=jax.random.uniform(ks[0], (in_ch,), jnp.float32, 0.5, 1.5),
        bn_beta=jax.random.normal(ks[1], (in_ch,), jnp.float32) * 0.1,
        bn_mean=jax.random.normal(ks[2], (in_ch,), jnp.float32) * 0.1,
        bn_var=jax.random.uniform(ks[3], (in_ch,), jnp.float32, 0.5, 1.5),
        route_w=jax.random.normal(ks[4], (num_experts, embeddings), jnp.float32) * 0.5,
        route_b=jnp.zeros((num_experts,), jnp.float32),
        conv_w=jax.random.normal(ks[5], (num_experts, out_ch, in_ch, 3, 3, 3),
                                 jnp.float32) * (2.0 / fan) ** 0.5,
        conv_b=jax.random.normal(ks[6], (num_experts, out_ch), jnp.float32) * 0.01,
    )


if __name__ == "__main__":
    key = jax.random.PRNGKey(0)
    kx, ke, kp = jax.random.split(key, 3)

    N, in_ch, D, H, W = 2, 4, 16, 16, 16
    out_ch, num_experts, embeddings = 8, 3, 1

    x = jax.random.normal(kx, (N, in_ch, D, H, W), jnp.float32)
    embedding = jax.random.normal(ke, (N, embeddings), jnp.float32)
    params = init_params(kp, in_ch, out_ch, num_experts, embeddings)

    out = jax.jit(single_conv_down_forward)(params, x, embedding)
    out = jax.block_until_ready(out)
    assert out.shape == (N, out_ch, D // 2, H // 2, W // 2)
    assert out.dtype == jnp.float32

    # loose sanity check vs pure-JAX f32 reference (kernel path uses bf16 pooled
    # activations, bf16 patches and bf16 MXU feeds with f32 accumulation)
    ref = jax.block_until_ready(jax.jit(reference_forward)(params, x, embedding))
    err = float(jnp.max(jnp.abs(out - ref)))
    tol = 0.1 * (1.0 + float(jnp.max(jnp.abs(ref))))
    assert err <= tol, (err, tol)

    print("KERNEL_OK")
</pallas_src>

<mosaic_0001>
module attributes {stable_mosaic.version = 11 : i64} {
  func.func @_bn_lrelu_pool_kernel(%arg0: i32, %arg1: i32, %arg2: memref<8x1xf32, #tpu.memory_space<vmem>>, %arg3: memref<8x1xf32, #tpu.memory_space<vmem>>, %arg4: memref<8x8x512xbf16, #tpu.memory_space<vmem>>, %arg5: memref<8x512xbf16, #tpu.memory_space<vmem>>) attributes {dimension_semantics = [#tpu.dimension_semantics<parallel>, #tpu.dimension_semantics<parallel>], iteration_bounds = array<i64: 1, 1>, scalar_prefetch = 0 : i64, scratch_operands = 0 : i64, tpu.core_type = #tpu.core_type<tc>, window_params = [{transform_indices = @transform_0, window_bounds = array<i64: 8, 1>}, {transform_indices = @transform_1, window_bounds = array<i64: 8, 1>}, {transform_indices = @transform_2, window_bounds = array<i64: 8, 8, 512>}, {transform_indices = @transform_3, window_bounds = array<i64: 8, 512>}]} {
    %c0 = arith.constant 0 : index
    %c0_0 = arith.constant 0 : index
    %0 = vector.load %arg2[%c0, %c0_0] : memref<8x1xf32, #tpu.memory_space<vmem>>, vector<8x1xf32>
    %c0_1 = arith.constant 0 : index
    %c0_2 = arith.constant 0 : index
    %c0_3 = arith.constant 0 : index
    %1 = vector.load %arg4[%c0_1, %c0_2, %c0_3] : memref<8x8x512xbf16, #tpu.memory_space<vmem>>, vector<1x8x512xbf16>
    %2 = vector.shape_cast %1 : vector<1x8x512xbf16> to vector<8x512xbf16>
    %3 = arith.extf %2 : vector<8x512xbf16> to vector<8x512xf32>
    %4 = vector.broadcast %0 : vector<8x1xf32> to vector<8x512xf32>
    %5 = arith.mulf %3, %4 : vector<8x512xf32>
    %c1 = arith.constant 1 : index
    %c0_4 = arith.constant 0 : index
    %c0_5 = arith.constant 0 : index
    %6 = vector.load %arg4[%c1, %c0_4, %c0_5] : memref<8x8x512xbf16, #tpu.memory_space<vmem>>, vector<1x8x512xbf16>
    %7 = vector.shape_cast %6 : vector<1x8x512xbf16> to vector<8x512xbf16>
    %8 = arith.extf %7 : vector<8x512xbf16> to vector<8x512xf32>
    %9 = vector.broadcast %0 : vector<8x1xf32> to vector<8x512xf32>
    %10 = arith.mulf %8, %9 : vector<8x512xf32>
    %11 = arith.maximumf %5, %10 : vector<8x512xf32>
    %c2 = arith.constant 2 : index
    %c0_6 = arith.constant 0 : index
    %c0_7 = arith.constant 0 : index
    %12 = vector.load %arg4[%c2, %c0_6, %c0_7] : memref<8x8x512xbf16, #tpu.memory_space<vmem>>, vector<1x8x512xbf16>
    %13 = vector.shape_cast %12 : vector<1x8x512xbf16> to vector<8x512xbf16>
    %14 = arith.extf %13 : vector<8x512xbf16> to vector<8x512xf32>
    %15 = vector.broadcast %0 : vector<8x1xf32> to vector<8x512xf32>
    %16 = arith.mulf %14, %15 : vector<8x512xf32>
    %17 = arith.maximumf %11, %16 : vector<8x512xf32>
    %c3 = arith.constant 3 : index
    %c0_8 = arith.constant 0 : index
    %c0_9 = arith.constant 0 : index
    %18 = vector.load %arg4[%c3, %c0_8, %c0_9] : memref<8x8x512xbf16, #tpu.memory_space<vmem>>, vector<1x8x512xbf16>
    %19 = vector.shape_cast %18 : vector<1x8x512xbf16> to vector<8x512xbf16>
    %20 = arith.extf %19 : vector<8x512xbf16> to vector<8x512xf32>
    %21 = vector.broadcast %0 : vector<8x1xf32> to vector<8x512xf32>
    %22 = arith.mulf %20, %21 : vector<8x512xf32>
    %23 = arith.maximumf %17, %22 : vector<8x512xf32>
    %c4 = arith.constant 4 : index
    %c0_10 = arith.constant 0 : index
    %c0_11 = arith.constant 0 : index
    %24 = vector.load %arg4[%c4, %c0_10, %c0_11] : memref<8x8x512xbf16, #tpu.memory_space<vmem>>, vector<1x8x512xbf16>
    %25 = vector.shape_cast %24 : vector<1x8x512xbf16> to vector<8x512xbf16>
    %26 = arith.extf %25 : vector<8x512xbf16> to vector<8x512xf32>
    %27 = vector.broadcast %0 : vector<8x1xf32> to vector<8x512xf32>
    %28 = arith.mulf %26, %27 : vector<8x512xf32>
    %29 = arith.maximumf %23, %28 : vector<8x512xf32>
    %c5 = arith.constant 5 : index
    %c0_12 = arith.constant 0 : index
    %c0_13 = arith.constant 0 : index
    %30 = vector.load %arg4[%c5, %c0_12, %c0_13] : memref<8x8x512xbf16, #tpu.memory_space<vmem>>, vector<1x8x512xbf16>
    %31 = vector.shape_cast %30 : vector<1x8x512xbf16> to vector<8x512xbf16>
    %32 = arith.extf %31 : vector<8x512xbf16> to vector<8x512xf32>
    %33 = vector.broadcast %0 : vector<8x1xf32> to vector<8x512xf32>
    %34 = arith.mulf %32, %33 : vector<8x512xf32>
    %35 = arith.maximumf %29, %34 : vector<8x512xf32>
    %c6 = arith.constant 6 : index
    %c0_14 = arith.constant 0 : index
    %c0_15 = arith.constant 0 : index
    %36 = vector.load %arg4[%c6, %c0_14, %c0_15] : memref<8x8x512xbf16, #tpu.memory_space<vmem>>, vector<1x8x512xbf16>
    %37 = vector.shape_cast %36 : vector<1x8x512xbf16> to vector<8x512xbf16>
    %38 = arith.extf %37 : vector<8x512xbf16> to vector<8x512xf32>
    %39 = vector.broadcast %0 : vector<8x1xf32> to vector<8x512xf32>
    %40 = arith.mulf %38, %39 : vector<8x512xf32>
    %41 = arith.maximumf %35, %40 : vector<8x512xf32>
    %c7 = arith.constant 7 : index
    %c0_16 = arith.constant 0 : index
    %c0_17 = arith.constant 0 : index
    %42 = vector.load %arg4[%c7, %c0_16, %c0_17] : memref<8x8x512xbf16, #tpu.memory_space<vmem>>, vector<1x8x512xbf16>
    %43 = vector.shape_cast %42 : vector<1x8x512xbf16> to vector<8x512xbf16>
    %44 = arith.extf %43 : vector<8x512xbf16> to vector<8x512xf32>
    %45 = vector.broadcast %0 : vector<8x1xf32> to vector<8x512xf32>
    %46 = arith.mulf %44, %45 : vector<8x512xf32>
    %47 = arith.maximumf %41, %46 : vector<8x512xf32>
    %c0_18 = arith.constant 0 : index
    %c0_19 = arith.constant 0 : index
    %48 = vector.load %arg3[%c0_18, %c0_19] : memref<8x1xf32, #tpu.memory_space<vmem>>, vector<8x1xf32>
    %49 = vector.broadcast %48 : vector<8x1xf32> to vector<8x512xf32>
    %50 = arith.addf %47, %49 : vector<8x512xf32>
    %cst = arith.constant 1.000000e-01 : f32
    %51 = vector.broadcast %cst : f32 to vector<8x512xf32>
    %52 = arith.mulf %51, %50 : vector<8x512xf32>
    %53 = arith.maximumf %50, %52 : vector<8x512xf32>
    %54 = arith.truncf %53 : vector<8x512xf32> to vector<8x512xbf16>
    %c0_20 = arith.constant 0 : index
    %c0_21 = arith.constant 0 : index
    %55 = vector.load %arg5[%c0_20, %c0_21] : memref<8x512xbf16, #tpu.memory_space<vmem>>, vector<8x512xbf16>
    tpu.vector_store %arg5[%c0_20, %c0_21], %54 {strides = array<i32>} : memref<8x512xbf16, #tpu.memory_space<vmem>>, vector<8x512xbf16>,
    return
  }
  func.func @transform_0(%arg0: i32, %arg1: i32) -> (i32, i32) {
    %c0_i32 = arith.constant 0 : i32
    %c0_i32_0 = arith.constant 0 : i32
    return %arg0, %c0_i32 : i32, i32
  }
  func.func @transform_1(%arg0: i32, %arg1: i32) -> (i32, i32) {
    %c0_i32 = arith.constant 0 : i32
    %c0_i32_0 = arith.constant 0 : i32
    return %arg0, %c0_i32 : i32, i32
  }
  func.func @transform_2(%arg0: i32, %arg1: i32) -> (i32, i32, i32) {
    %c0_i32 = arith.constant 0 : i32
    %c0_i32_0 = arith.constant 0 : i32
    return %c0_i32, %arg0, %arg1 : i32, i32, i32
  }
  func.func @transform_3(%arg0: i32, %arg1: i32) -> (i32, i32) {
    %c0_i32 = arith.constant 0 : i32
    return %arg0, %arg1 : i32, i32
  }
}

module attributes {stable_mosaic.version = 11 : i64} {
  func.func @_condconv_kernel(%arg0: i32, %arg1: i32, %arg2: memref<2x3xf32, #tpu.memory_space<smem>>, %arg3: memref<1x128x512xbf16, #tpu.memory_space<vmem>>, %arg4: memref<3x128x128xbf16, #tpu.memory_space<vmem>>, %arg5: memref<3x128x1xf32, #tpu.memory_space<vmem>>, %arg6: memref<1x128x512xf32, #tpu.memory_space<vmem>>, %arg7: memref<128x128xbf16, #tpu.memory_space<vmem>>, %arg8: memref<128x1xf32, #tpu.memory_space<vmem>>) attributes {dimension_semantics = [#tpu.dimension_semantics<parallel>, #tpu.dimension_semantics<arbitrary>], iteration_bounds = array<i64: 2, 1>, scalar_prefetch = 0 : i64, scratch_operands = 2 : i64, tpu.core_type = #tpu.core_type<tc>, window_params = [{transform_indices = @transform_0, window_bounds = array<i64: 2, 3>}, {transform_indices = @transform_1, window_bounds = array<i64: 1, 128, 512>}, {pipeline_mode = #tpu.pipeline_mode<synchronous>, transform_indices = @transform_2, window_bounds = array<i64: 3, 128, 128>}, {pipeline_mode = #tpu.pipeline_mode<synchronous>, transform_indices = @transform_3, window_bounds = array<i64: 3, 128, 1>}, {transform_indices = @transform_4, window_bounds = array<i64: 1, 128, 512>}]} {
    %c0_i32 = arith.constant 0 : i32
    %0 = arith.cmpi eq, %arg1, %c0_i32 : i32
    %1 = arith.extui %0 : i1 to i32
    %c0_i32_0 = arith.constant 0 : i32
    %2 = arith.cmpi ne, %1, %c0_i32_0 : i32
    scf.if %2 {
      %13 = arith.index_cast %arg0 : i32 to index
      %c0_10 = arith.constant 0 : index
      %14 = memref.load %arg2[%13, %c0_10] : memref<2x3xf32, #tpu.memory_space<smem>>
      %c0_11 = arith.constant 0 : index
      %c0_12 = arith.constant 0 : index
      %c0_13 = arith.constant 0 : index
      %15 = vector.load %arg4[%c0_11, %c0_12, %c0_13] : memref<3x128x128xbf16, #tpu.memory_space<vmem>>, vector<1x128x128xbf16>
      %16 = vector.shape_cast %15 : vector<1x128x128xbf16> to vector<128x128xbf16>
      %17 = arith.extf %16 : vector<128x128xbf16> to vector<128x128xf32>
      %18 = vector.broadcast %14 : f32 to vector<128x128xf32>
      %19 = arith.mulf %18, %17 : vector<128x128xf32>
      %20 = arith.index_cast %arg0 : i32 to index
      %c0_14 = arith.constant 0 : index
      %21 = memref.load %arg2[%20, %c0_14] : memref<2x3xf32, #tpu.memory_space<smem>>
      %c0_15 = arith.constant 0 : index
      %c0_16 = arith.constant 0 : index
      %c0_17 = arith.constant 0 : index
      %22 = vector.load %arg5[%c0_15, %c0_16, %c0_17] : memref<3x128x1xf32, #tpu.memory_space<vmem>>, vector<1x128x1xf32>
      %23 = vector.shape_cast %22 : vector<1x128x1xf32> to vector<128x1xf32>
      %24 = vector.broadcast %21 : f32 to vector<128x1xf32>
      %25 = arith.mulf %24, %23 : vector<128x1xf32>
      %26 = arith.index_cast %arg0 : i32 to index
      %c1 = arith.constant 1 : index
      %27 = memref.load %arg2[%26, %c1] : memref<2x3xf32, #tpu.memory_space<smem>>
      %c1_18 = arith.constant 1 : index
      %c0_19 = arith.constant 0 : index
      %c0_20 = arith.constant 0 : index
      %28 = vector.load %arg4[%c1_18, %c0_19, %c0_20] : memref<3x128x128xbf16, #tpu.memory_space<vmem>>, vector<1x128x128xbf16>
      %29 = vector.shape_cast %28 : vector<1x128x128xbf16> to vector<128x128xbf16>
      %30 = arith.extf %29 : vector<128x128xbf16> to vector<128x128xf32>
      %31 = vector.broadcast %27 : f32 to vector<128x128xf32>
      %32 = arith.mulf %31, %30 : vector<128x128xf32>
      %33 = arith.addf %19, %32 : vector<128x128xf32>
      %34 = arith.index_cast %arg0 : i32 to index
      %c1_21 = arith.constant 1 : index
      %35 = memref.load %arg2[%34, %c1_21] : memref<2x3xf32, #tpu.memory_space<smem>>
      %c1_22 = arith.constant 1 : index
      %c0_23 = arith.constant 0 : index
      %c0_24 = arith.constant 0 : index
      %36 = vector.load %arg5[%c1_22, %c0_23, %c0_24] : memref<3x128x1xf32, #tpu.memory_space<vmem>>, vector<1x128x1xf32>
      %37 = vector.shape_cast %36 : vector<1x128x1xf32> to vector<128x1xf32>
      %38 = vector.broadcast %35 : f32 to vector<128x1xf32>
      %39 = arith.mulf %38, %37 : vector<128x1xf32>
      %40 = arith.addf %25, %39 : vector<128x1xf32>
      %41 = arith.index_cast %arg0 : i32 to index
      %c2 = arith.constant 2 : index
      %42 = memref.load %arg2[%41, %c2] : memref<2x3xf32, #tpu.memory_space<smem>>
      %c2_25 = arith.constant 2 : index
      %c0_26 = arith.constant 0 : index
      %c0_27 = arith.constant 0 : index
      %43 = vector.load %arg4[%c2_25, %c0_26, %c0_27] : memref<3x128x128xbf16, #tpu.memory_space<vmem>>, vector<1x128x128xbf16>
      %44 = vector.shape_cast %43 : vector<1x128x128xbf16> to vector<128x128xbf16>
      %45 = arith.extf %44 : vector<128x128xbf16> to vector<128x128xf32>
      %46 = vector.broadcast %42 : f32 to vector<128x128xf32>
      %47 = arith.mulf %46, %45 : vector<128x128xf32>
      %48 = arith.addf %33, %47 : vector<128x128xf32>
      %49 = arith.index_cast %arg0 : i32 to index
      %c2_28 = arith.constant 2 : index
      %50 = memref.load %arg2[%49, %c2_28] : memref<2x3xf32, #tpu.memory_space<smem>>
      %c2_29 = arith.constant 2 : index
      %c0_30 = arith.constant 0 : index
      %c0_31 = arith.constant 0 : index
      %51 = vector.load %arg5[%c2_29, %c0_30, %c0_31] : memref<3x128x1xf32, #tpu.memory_space<vmem>>, vector<1x128x1xf32>
      %52 = vector.shape_cast %51 : vector<1x128x1xf32> to vector<128x1xf32>
      %53 = vector.broadcast %50 : f32 to vector<128x1xf32>
      %54 = arith.mulf %53, %52 : vector<128x1xf32>
      %55 = arith.addf %40, %54 : vector<128x1xf32>
      %56 = arith.truncf %48 : vector<128x128xf32> to vector<128x128xbf16>
      %c0_32 = arith.constant 0 : index
      %c0_33 = arith.constant 0 : index
      %57 = vector.load %arg7[%c0_32, %c0_33] : memref<128x128xbf16, #tpu.memory_space<vmem>>, vector<128x128xbf16>
      tpu.vector_store %arg7[%c0_32, %c0_33], %56 {strides = array<i32>} : memref<128x128xbf16, #tpu.memory_space<vmem>>, vector<128x128xbf16>,
      %c0_34 = arith.constant 0 : index
      %c0_35 = arith.constant 0 : index
      %58 = vector.load %arg8[%c0_34, %c0_35] : memref<128x1xf32, #tpu.memory_space<vmem>>, vector<128x1xf32>
      tpu.vector_store %arg8[%c0_34, %c0_35], %55 {strides = array<i32>} : memref<128x1xf32, #tpu.memory_space<vmem>>, vector<128x1xf32>,
    } else {
    }
    %c0 = arith.constant 0 : index
    %c0_1 = arith.constant 0 : index
    %3 = vector.load %arg7[%c0, %c0_1] : memref<128x128xbf16, #tpu.memory_space<vmem>>, vector<128x128xbf16>
    %c0_2 = arith.constant 0 : index
    %c0_3 = arith.constant 0 : index
    %c0_4 = arith.constant 0 : index
    %4 = vector.load %arg3[%c0_2, %c0_3, %c0_4] : memref<1x128x512xbf16, #tpu.memory_space<vmem>>, vector<1x128x512xbf16>
    %5 = vector.shape_cast %4 : vector<1x128x512xbf16> to vector<128x512xbf16>
    %cst = arith.constant dense<0.000000e+00> : vector<128x512xf32>
    %6 = tpu.matmul %3, %5, %cst {dimension_numbers = #tpu.dot_dimension_numbers<[1], [0], [0], [1], [0, 0, 1, 1], [], []>} : vector<128x128xbf16>, vector<128x512xbf16>, vector<128x512xf32> -> vector<128x512xf32>
    %c0_5 = arith.constant 0 : index
    %c0_6 = arith.constant 0 : index
    %7 = vector.load %arg8[%c0_5, %c0_6] : memref<128x1xf32, #tpu.memory_space<vmem>>, vector<128x1xf32>
    %8 = vector.broadcast %7 : vector<128x1xf32> to vector<128x512xf32>
    %9 = arith.addf %6, %8 : vector<128x512xf32>
    %c0_7 = arith.constant 0 : index
    %c0_8 = arith.constant 0 : index
    %c0_9 = arith.constant 0 : index
    %10 = vector.load %arg6[%c0_7, %c0_8, %c0_9] : memref<1x128x512xf32, #tpu.memory_space<vmem>>, vector<1x128x512xf32>
    %11 = vector.shape_cast %10 : vector<1x128x512xf32> to vector<128x512xf32>
    %12 = vector.shape_cast %9 : vector<128x512xf32> to vector<1x128x512xf32>
    tpu.vector_store %arg6[%c0_7, %c0_8, %c0_9], %12 {strides = array<i32>} : memref<1x128x512xf32, #tpu.memory_space<vmem>>, vector<1x128x512xf32>,
    return
  }
  func.func @transform_0(%arg0: i32, %arg1: i32) -> (i32, i32) {
    %c0_i32 = arith.constant 0 : i32
    %c0_i32_0 = arith.constant 0 : i32
    %c0_i32_1 = arith.constant 0 : i32
    return %c0_i32, %c0_i32_0 : i32, i32
  }
  func.func @transform_1(%arg0: i32, %arg1: i32) -> (i32, i32, i32) {
    %c0_i32 = arith.constant 0 : i32
    %c0_i32_0 = arith.constant 0 : i32
    return %arg0, %c0_i32, %arg1 : i32, i32, i32
  }
  func.func @transform_2(%arg0: i32, %arg1: i32) -> (i32, i32, i32) {
    %c0_i32 = arith.constant 0 : i32
    %c0_i32_0 = arith.constant 0 : i32
    %c0_i32_1 = arith.constant 0 : i32
    %c0_i32_2 = arith.constant 0 : i32
    return %c0_i32, %c0_i32_0, %c0_i32_1 : i32, i32, i32
  }
  func.func @transform_3(%arg0: i32, %arg1: i32) -> (i32, i32, i32) {
    %c0_i32 = arith.constant 0 : i32
    %c0_i32_0 = arith.constant 0 : i32
    %c0_i32_1 = arith.constant 0 : i32
    %c0_i32_2 = arith.constant 0 : i32
    return %c0_i32, %c0_i32_0, %c0_i32_1 : i32, i32, i32
  }
  func.func @transform_4(%arg0: i32, %arg1: i32) -> (i32, i32, i32) {
    %c0_i32 = arith.constant 0 : i32
    %c0_i32_0 = arith.constant 0 : i32
    return %arg0, %c0_i32, %arg1 : i32, i32, i32
  }
}

</mosaic_0001>

<bundles_post_ra>
// kernel: tile.13
= control target key start
LH: loop header
LB: loop body
LE: loop exit
PB: predicated region body
PF: predicated region fallthrough
CT: control target
= control target key end

     0   :  { %s22_s0 = inlined_call_operand.vmem [shape: f32[4], index: 0, kind: input, shape index: {}]   ;;  %s23_s1 = inlined_call_operand.vmem [shape: f32[2,4], index: 1, kind: output, shape index: {}]  }
   0x1   :  { %v4_v0 = vld [vmem:[%s22_s0] ss:$0 sm:$0xff] }
   0x2   :  { %5 = vst [vmem:[%s23_s1] sm:$0x3] %v4_v0 }

// kernel: tile.0
= control target key start
LH: loop header
LB: loop body
LE: loop exit
PB: predicated region body
PF: predicated region fallthrough
CT: control target
= control target key end

     0   :  { %s34_s8 = smov 125   ;;  %vm7_vm0 = vcmask 7168   ;;  %s35_s11 = smov 126   ;;  %s61_s0 = inlined_call_operand.vmem [shape: f32[2,4], index: 0, kind: input, shape index: {}]   ;;  %s62_s1 = inlined_call_operand.vmem [shape: f32[8,1], index: 1, kind: output, shape index: {}]  }
   0x1   :  { %v4_v0 = vld [vmem:[%s61_s0] sm:$0x3]  ;;  %s33_s0 = smov 127  }
   0x2   :  { %5 = vst [vmem:[#allocation0] sm:$0x3] %v4_v0 }
   0x9   :  { %v9_v1 = vld [vmem:[#allocation0] sm:$0x3]  }
   0xa   :  { %v21_v2 = vld [vmem:[#allocation0] sm:$0x3]   ;;  %10 = vrot.lane.b32.xlu0 %v9_v1, %s33_s0 }
   0xb   :  { %22 = vrot.lane.b32.xlu1 %v21_v2, %s34_s8  ;;  %v6_v3 = vld [vmem:[#allocation0] sm:$0x3]  }
   0xc   :  { %v15_v4 = vld [vmem:[#allocation0] sm:$0x3]   ;;  %8 = vst.msk [vmem:[%s62_s1] ss:$4 sm:$0x3] %vm7_vm0, %v6_v3  }
   0xe   :  { %16 = vrot.lane.b32.xlu0 %v15_v4, %s35_s11 }
  0x7c   :  { %v11_v5 = vpop.permute.xlu0 %10  }
  0x7d   :  { %v23_v6 = vpop.permute.xlu1 %22   ;;  %27 = vst.msk [vmem:[%s62_s1 + $0x1] ss:$4 sm:$0x3] %vm7_vm0, %v11_v5  }
  0x7e   :  { %29 = vst.msk [vmem:[%s62_s1 + $0x3] ss:$4 sm:$0x3] %vm7_vm0, %v23_v6  }
  0x80   :  { %v17_v7 = vpop.permute.xlu0 %16  }
  0x81   :  { %28 = vst.msk [vmem:[%s62_s1 + $0x2] ss:$4 sm:$0x3] %vm7_vm0, %v17_v7  }

// kernel: single_conv_down_forward.2
= control target key start
LH: loop header
LB: loop body
LE: loop exit
PB: predicated region body
PF: predicated region fallthrough
CT: control target
= control target key end

     0   :  { %v195_v0 = vmov 0   ;;  %s292_s0 = inlined_call_operand.vmem [shape: f32[8,1], index: 0, kind: input, shape index: {}]   ;;  %s293_s1 = inlined_call_operand.vmem [shape: f32[8,1], index: 1, kind: input, shape index: {}]   ;;  %s294_s2 = inlined_call_operand.vmem [shape: bf16[8,8,512], index: 2, kind: input, shape index: {}]   ;;  %s295_s3 = inlined_call_operand.vmem [shape: bf16[8,512], index: 3, kind: output, shape index: {}]  }
   0x1   :  { %194 = vset.pattern.permute.xlu0 %v195_v0  ;;  %v14_v1 = vld [vmem:[%s292_s0] sm:$0xff]  ;;  %v16_v4 = vld [vmem:[%s294_s2 + $0x8] sm:$0xff]  ;;  %v175_v5 = vld [vmem:[%s294_s2 + $0x10] sm:$0xff] }
   0x2   :  { %23 = vperm.xlu0 %194, %v14_v1   ;;  %v135_v2 = vld [vmem:[%s293_s1] sm:$0xff]  ;;  %v176_v6 = vld [vmem:[%s294_s2 + $0x18] sm:$0xff]  ;;  %v178_v8 = vld [vmem:[%s294_s2 + $0x28] sm:$0xff]  ;;  %v19_v11 = vunpack.c.l.bf16 %v16_v4  ;;  %v20_v12 = vunpack.c.h.bf16 %v16_v4  ;;  %v33_v15 = vunpack.c.l.bf16 %v175_v5  ;;  %v34_v16 = vunpack.c.h.bf16 %v175_v5 }
   0x3   :  { %v15_v3 = vld [vmem:[%s294_s2] sm:$0xff]  ;;  %v179_v13 = vld [vmem:[%s294_s2 + $0x30] sm:$0xff]  ;;  %v180_v14 = vld [vmem:[%s294_s2 + $0x38] sm:$0xff]  ;;  %v35_v17 = vunpack.c.l.bf16 %v176_v6  ;;  %v36_v18 = vunpack.c.h.bf16 %v176_v6  ;;  %v50_v23 = vunpack.c.l.bf16 %v178_v8  ;;  %v51_v24 = vunpack.c.h.bf16 %v178_v8 }
   0x4   :  { %v177_v7 = vld [vmem:[%s294_s2 + $0x20] sm:$0xff]  ;;  %v17_v9 = vunpack.c.l.bf16 %v15_v3  ;;  %v18_v10 = vunpack.c.h.bf16 %v15_v3  ;;  %v182_v20 = vld [vmem:[%s294_s2 + $0x48] sm:$0xff]  ;;  %v183_v25 = vld [vmem:[%s294_s2 + $0x50] sm:$0xff]  ;;  %v63_v27 = vunpack.c.l.bf16 %v179_v13  ;;  %v64_v28 = vunpack.c.h.bf16 %v179_v13 }
   0x5   :  { %v181_v19 = vld [vmem:[%s294_s2 + $0x40] sm:$0xff]  ;;  %v48_v21 = vunpack.c.l.bf16 %v177_v7  ;;  %v49_v22 = vunpack.c.h.bf16 %v177_v7  ;;  %v184_v26 = vld [vmem:[%s294_s2 + $0x58] sm:$0xff]  ;;  %v65_v29 = vunpack.c.l.bf16 %v180_v14  ;;  %v66_v30 = vunpack.c.h.bf16 %v180_v14  ;;  %v266_v32 = vld [vmem:[%s294_s2 + $0x68] sm:$0xff] }
   0x6   :  { %138 = vperm.xlu0 %194, %v135_v2   ;;  %v261_v31 = vld [vmem:[%s294_s2 + $0x60] sm:$0xff]  ;;  %v78_v33 = vunpack.c.l.bf16 %v181_v19  ;;  %v79_v34 = vunpack.c.h.bf16 %v181_v19  ;;  %v80_v35 = vunpack.c.l.bf16 %v182_v20  ;;  %v81_v36 = vunpack.c.h.bf16 %v182_v20  ;;  %v271_v37 = vld [vmem:[%s294_s2 + $0x70] sm:$0xff]  ;;  %v276_v38 = vld [vmem:[%s294_s2 + $0x78] sm:$0xff] }
   0x7   :  { %v93_v39 = vunpack.c.l.bf16 %v183_v25  ;;  %v94_v40 = vunpack.c.h.bf16 %v183_v25  ;;  %v95_v41 = vunpack.c.l.bf16 %v184_v26  ;;  %v96_v42 = vunpack.c.h.bf16 %v184_v26 }
   0x8   :  { %v108_v43 = vunpack.c.l.bf16 %v261_v31  ;;  %v109_v44 = vunpack.c.h.bf16 %v261_v31  ;;  %v110_v45 = vunpack.c.l.bf16 %v266_v32  ;;  %v111_v46 = vunpack.c.h.bf16 %v266_v32 }
   0x9   :  { %v123_v48 = vunpack.c.l.bf16 %v271_v37  ;;  %v124_v49 = vunpack.c.h.bf16 %v271_v37  ;;  %v125_v50 = vunpack.c.l.bf16 %v276_v38  ;;  %v126_v51 = vunpack.c.h.bf16 %v276_v38 }
  0x81   :  { %v24_v47 = vpop.permute.xlu0 %23 }
  0x82   :  { %v26_v52 = vmul.f32 %v24_v47, %v17_v9  ;;  %v27_v53 = vmul.f32 %v24_v47, %v18_v10  ;;  %v28_v54 = vmul.f32 %v24_v47, %v19_v11  ;;  %v29_v55 = vmul.f32 %v24_v47, %v20_v12 }
  0x83   :  { %v37_v56 = vmul.f32 %v33_v15, %v24_v47  ;;  %v38_v57 = vmul.f32 %v34_v16, %v24_v47  ;;  %v39_v58 = vmul.f32 %v35_v17, %v24_v47  ;;  %v40_v59 = vmul.f32 %v36_v18, %v24_v47 }
  0x84   :  { %v52_v60 = vmul.f32 %v48_v21, %v24_v47  ;;  %v53_v61 = vmul.f32 %v49_v22, %v24_v47  ;;  %v54_v62 = vmul.f32 %v50_v23, %v24_v47  ;;  %v55_v63 = vmul.f32 %v51_v24, %v24_v47 }
  0x85   :  { %v41_v0 = vmax.f32 %v26_v52, %v37_v56  ;;  %v42_v1 = vmax.f32 %v27_v53, %v38_v57  ;;  %v43_v2 = vmax.f32 %v28_v54, %v39_v58  ;;  %v44_v3 = vmax.f32 %v29_v55, %v40_v59 }
  0x86   :  { %v67_v4 = vmul.f32 %v63_v27, %v24_v47  ;;  %v68_v5 = vmul.f32 %v64_v28, %v24_v47  ;;  %v69_v6 = vmul.f32 %v65_v29, %v24_v47  ;;  %v70_v7 = vmul.f32 %v66_v30, %v24_v47 }
  0x87   :  { %v56_v8 = vmax.f32 %v41_v0, %v52_v60  ;;  %v57_v9 = vmax.f32 %v42_v1, %v53_v61  ;;  %v58_v10 = vmax.f32 %v43_v2, %v54_v62  ;;  %v59_v11 = vmax.f32 %v44_v3, %v55_v63 }
  0x88   :  { %v82_v12 = vmul.f32 %v78_v33, %v24_v47  ;;  %v83_v13 = vmul.f32 %v79_v34, %v24_v47  ;;  %v84_v14 = vmul.f32 %v80_v35, %v24_v47  ;;  %v85_v15 = vmul.f32 %v81_v36, %v24_v47 }
  0x89   :  { %v71_v16 = vmax.f32 %v56_v8, %v67_v4  ;;  %v72_v17 = vmax.f32 %v57_v9, %v68_v5  ;;  %v73_v18 = vmax.f32 %v58_v10, %v69_v6  ;;  %v74_v19 = vmax.f32 %v59_v11, %v70_v7 }
  0x8a   :  { %v97_v20 = vmul.f32 %v93_v39, %v24_v47  ;;  %v98_v21 = vmul.f32 %v94_v40, %v24_v47  ;;  %v99_v22 = vmul.f32 %v95_v41, %v24_v47  ;;  %v100_v23 = vmul.f32 %v96_v42, %v24_v47 }
  0x8b   :  { %v86_v24 = vmax.f32 %v71_v16, %v82_v12  ;;  %v87_v25 = vmax.f32 %v72_v17, %v83_v13  ;;  %v88_v26 = vmax.f32 %v73_v18, %v84_v14  ;;  %v89_v27 = vmax.f32 %v74_v19, %v85_v15 }
  0x8c   :  { %v112_v28 = vmul.f32 %v108_v43, %v24_v47  ;;  %v113_v29 = vmul.f32 %v109_v44, %v24_v47  ;;  %v114_v30 = vmul.f32 %v110_v45, %v24_v47  ;;  %v115_v31 = vmul.f32 %v111_v46, %v24_v47  ;;  %v139_v43 = vpop.permute.xlu0 %138 }
  0x8d   :  { %v101_v32 = vmax.f32 %v86_v24, %v97_v20  ;;  %v102_v33 = vmax.f32 %v87_v25, %v98_v21  ;;  %v103_v34 = vmax.f32 %v88_v26, %v99_v22  ;;  %v104_v35 = vmax.f32 %v89_v27, %v100_v23 }
  0x8e   :  { %v127_v36 = vmul.f32 %v123_v48, %v24_v47  ;;  %v128_v37 = vmul.f32 %v124_v49, %v24_v47  ;;  %v129_v38 = vmul.f32 %v125_v50, %v24_v47  ;;  %v130_v52 = vmul.f32 %v126_v51, %v24_v47 }
  0x8f   :  { %v116_v39 = vmax.f32 %v101_v32, %v112_v28  ;;  %v117_v40 = vmax.f32 %v102_v33, %v113_v29  ;;  %v118_v41 = vmax.f32 %v103_v34, %v114_v30  ;;  %v119_v42 = vmax.f32 %v104_v35, %v115_v31 }
  0x91   :  { %v131_v53 = vmax.f32 %v116_v39, %v127_v36  ;;  %v132_v54 = vmax.f32 %v117_v40, %v128_v37  ;;  %v133_v55 = vmax.f32 %v118_v41, %v129_v38  ;;  %v134_v56 = vmax.f32 %v119_v42, %v130_v52 }
  0x93   :  { %v141_v44 = vadd.f32 %v139_v43, %v131_v53  ;;  %v142_v45 = vadd.f32 %v139_v43, %v132_v54  ;;  %v143_v46 = vadd.f32 %v139_v43, %v133_v55  ;;  %v144_v57 = vadd.f32 %v139_v43, %v134_v56 }
  0x95   :  { %v145_v58 = vmul.f32 0.1, %v141_v44  ;;  %v146_v59 = vmul.f32 0.1, %v142_v45  ;;  %v147_v60 = vmul.f32 0.1, %v143_v46 }
  0x96   :  { %v148_v48 = vmul.f32 0.1, %v144_v57 }
  0x97   :  { %v149_v49 = vmax.f32 %v141_v44, %v145_v58  ;;  %v150_v50 = vmax.f32 %v142_v45, %v146_v59  ;;  %v151_v47 = vmax.f32 %v143_v46, %v147_v60 }
  0x98   :  { %v152_v51 = vmax.f32 %v144_v57, %v148_v48 }
  0x99   :  { %v191_v61 = vpack.c.bf16 %v150_v50, %v149_v49 }
  0x9a   :  { %v192_v62 = vpack.c.bf16 %v152_v51, %v151_v47 }
  0x9b   :  { %169 = vst [vmem:[%s295_s3] sm:$0xff] %v191_v61 }
  0x9c   :  { %170 = vst [vmem:[%s295_s3 + $0x8] sm:$0xff] %v192_v62 }

// kernel: single_conv_down_forward.3
= control target key start
LH: loop header
LB: loop body
LE: loop exit
PB: predicated region body
PF: predicated region fallthrough
CT: control target
= control target key end

     0   :  { %9 = vsyncpa [#allocation5], 0  ;;  %s1678_s15 = smov 0   ;;  %s1680_s16 = smov 0   ;;  %s2252_s0 = inlined_call_operand.vmem [shape: f32[2,3], index: 0, kind: input, shape index: {}]   ;;  %s2253_s1 = inlined_call_operand.vmem [shape: bf16[2,128,512], index: 1, kind: input, shape index: {}]   ;;  %s2254_s2 = inlined_call_operand.vmem [shape: bf16[3,128,128], index: 2, kind: input, shape index: {}]   ;;  %s2255_s3 = inlined_call_operand.vmem [shape: f32[3,128,1], index: 3, kind: input, shape index: {}]   ;;  %s2256_s4 = inlined_call_operand.vmem [shape: f32[2,128,512], index: 4, kind: output, shape index: {}]  }
   0x1   :  { %s1682_s17 = smov 0  }
   0x2 LB: > { %s1291_s18 = sadd.s32 4294967295, %s1649_s17   ;;  %s27_s19 = sadd.s32 1, %s1645_s16  ;;  %s1649_s17 = sphi %s1682_s17, %s15_s17   ;;  %s1645_s16 = sphi %s1680_s16, %s2260_s16   ;;  %s1641_s15 = sphi %s1678_s15, %s2259_s15  }
   0x3   : > { %p29_p0 = scmp.ge.s32.totalorder %s27_s19, 2  ;;  %p1293_p1 = scmp.ge.s32.totalorder %s1649_s17, 1 }
   0x4   : > { %p151_p2 = scmp.lt.s32.totalorder %s1649_s17, 3  ;;  %p1703_p4 = scmp.eq.s32.totalorder %s1291_s18, 0 }
   0x5   : > { %s2262_s19 = smov (%p29_p0, %s27_s19), 0  ;;  %s164_s24 = sshll.u32 %s2252_s0, 4  ;;  %s165_s24 = int_to_ptr.vmem [resolvable:$true] %s164_s24 }
   0x6   : > { %p1699_p3 = pnand %p1293_p1, %p151_p2  ;;  %s1608_s25 = scalar_lea.vmem %s165_s24, 32 }
   0x7   : > { %p1609_p7 = scmp.ne.s32.totalorder %s165_s24, %s1608_s25  ;;  %p1616_p11 = scmp.lt.s32.totalorder %s165_s24, %s165_s24 }
   0x8   : > { %p1526_p5 = pneg %p1699_p3  ;;  %p1617_p12 = scmp.lt.s32.totalorder %s1608_s25, %s1608_s25 }
   0xa   : > { %p1527_p6 = pnand %p1703_p4, %p1526_p5  ;;  %p1618_p13 = por %p1617_p12, %p1616_p11 }
   0xc   : > { %p1610_p8 = pneg %p1527_p6 }
   0xe   : > { %p1611_p9 = pnand %p1610_p8, %p1609_p7 }
  0x10   : > { %p1612_p10 = pneg %p1611_p9 }
  0x12   : > { %p1619_p0 = pnand %p1618_p13, %p1612_p10 }
  0x14   : > { %1622 = shalt.err (!%p1619_p0)
}
  0x15   : > { %s1651_s26 = smov [#allocation4]   ;;  %196 = sbr.rel (%p1699_p3) target bundleno = 344 (0x158), region = 36 }
  0x16   : > { %1529 = dma.vmem_to_smem (!%p1527_p6), %s165_s24, 32, %s1651_s26, [#allocation5]  }
  0x1c   : > { %1636 = dma.done.wait (%p1703_p4), [#allocation5], 32  }
  0x1d   : > { %1638 = vsyncadd (%p1703_p4), [#allocation5], 4294967264 }
  0x1e   : > { %202 = sfence }
  0x1f   : > { %p232_p1 = scmp.lt.s32.totalorder %s1641_s15, 1  ;;  %v1652_v0 = vmov 0   ;;  %s1730_s29 = sshll.u32 %s1641_s15, 7  ;;  %v1404_v9 = vld [vmem:[%s2254_s2] sm:$0xff]   ;;  %v1499_v16 = vld [vmem:[%s2254_s2 + $0x8] sm:$0xff]   ;;  %v1500_v22 = vld [vmem:[%s2254_s2 + $0x10] sm:$0xff]  }
  0x20   : > { %934 = vmatprep.mubr.bf16.mxu0 %v1652_v0  ;;  %1047 = vmatprep.mubr.bf16.mxu1 %v1652_v0  ;;  %s339_s7 = sadd.s32 1, %s1730_s29  ;;  %s1744_s8 = sld [smem:[#allocation4 + %s1730_s29]]  ;;  %v1506_v11 = vld [vmem:[%s2254_s2 + $0x40] sm:$0xff]   ;;  %v1507_v17 = vld [vmem:[%s2254_s2 + $0x48] sm:$0xff]   ;;  %v1405_v21 = vunpack.c.l.bf16 %v1404_v9  ;;  %v1508_v23 = vld [vmem:[%s2254_s2 + $0x50] sm:$0xff]   ;;  %v1406_v25 = vunpack.c.h.bf16 %v1404_v9  ;;  %v1409_v33 = vunpack.c.l.bf16 %v1499_v16  ;;  %v1410_v37 = vunpack.c.h.bf16 %v1499_v16 }
  0x21   : > { %s1724_s27 = scalar_select %p232_p1, %s1641_s15, 1  ;;  %1558 = vset.pattern.permute.xlu0 %v1652_v0  ;;  %1559 = vset.pattern.permute.xlu1 %v1652_v0  ;;  %v1765_v15 = vld [vmem:[%s2254_s2 + $0x80] sm:$0xff]   ;;  %v1779_v19 = vld [vmem:[%s2254_s2 + $0x88] sm:$0xff]   ;;  %v1437_v27 = vunpack.c.l.bf16 %v1506_v11  ;;  %v1438_v28 = vunpack.c.h.bf16 %v1506_v11  ;;  %v1441_v34 = vunpack.c.l.bf16 %v1507_v17  ;;  %v1442_v38 = vunpack.c.h.bf16 %v1507_v17  ;;  %v1516_v44 = vld [vmem:[%s2254_s2 + $0x90] sm:$0xff]  }
  0x22   : > { %s1748_s9 = sld [smem:[#allocation4 + %s339_s7]]  ;;  %s456_s12 = sadd.s32 2, %s1730_s29  ;;  %v1469_v32 = vunpack.c.l.bf16 %v1765_v15  ;;  %v1470_v36 = vunpack.c.h.bf16 %v1765_v15  ;;  %v1473_v39 = vunpack.c.l.bf16 %v1779_v19  ;;  %v1413_v40 = vunpack.c.l.bf16 %v1500_v22  ;;  %v1501_v51 = vld [vmem:[%s2254_s2 + $0x18] sm:$0xff]  }
  0x23   : > { %s1401_s28 = sshll.u32 %s1724_s27, 8  ;;  %s1774_s24 = sld [smem:[#allocation4 + %s456_s12]]  ;;  %v1414_v41 = vunpack.c.h.bf16 %v1500_v22  ;;  %v1445_v42 = vunpack.c.l.bf16 %v1508_v23  ;;  %v1446_v43 = vunpack.c.h.bf16 %v1508_v23  ;;  %v1816_v52 = vld [vmem:[%s2254_s2 + $0x58] sm:$0xff]   ;;  %v1474_v57 = vunpack.c.h.bf16 %v1779_v19 }
  0x24   : > { %s1735_s6 = scalar_lea.vmem %s2253_s1, %s1401_s28  ;;  %v1477_v61 = vunpack.c.l.bf16 %v1516_v44  ;;  %v1478_v62 = vunpack.c.h.bf16 %v1516_v44  ;;  %v307_v44 = vld [vmem:[%s2255_s3] sm:$0xff]  ;;  %vm589_vm0 = vcmask 7168   ;;  %s1402_s29 = sshll.u32 %s1724_s27, 9 }
  0x25   : > { %v1560_v1 = vld [vmem:[%s1735_s6 + $0x4] ss:$16 sps:$4 sm:$0xff]   ;;  %v1562_v2 = vld [vmem:[%s1735_s6 + $0xc] ss:$16 sps:$4 sm:$0xff]   ;;  %v1564_v3 = vld [vmem:[%s1735_s6] ss:$16 sps:$4 sm:$0xff]   ;;  %s2177_s7 = scalar_lea.vmem %s2256_s4, %s1402_s29 }
  0x26   : > { %902 = vmatprep.subr.bf16.mxu0 %v1560_v1  ;;  %v1565_v4 = vld [vmem:[%s1735_s6 + $0x8] ss:$16 sps:$4 sm:$0xff]   ;;  %1015 = vmatprep.subr.bf16.mxu1 %v1562_v2  ;;  %v1566_v5 = vld [vmem:[%s1735_s6 + $0x24] ss:$16 sps:$4 sm:$0xff]   ;;  %v1568_v6 = vld [vmem:[%s1735_s6 + $0x2c] ss:$16 sps:$4 sm:$0xff]   ;;  %v1790_v26 = vstv %s1744_s8 }
  0x27   : > { %903 = vmatpush1.bf16.msra.mxu0 %v1564_v3  ;;  %1016 = vmatpush1.bf16.msra.mxu1 %v1565_v4  ;;  %v1570_v7 = vld [vmem:[%s1735_s6 + $0x20] ss:$16 sps:$4 sm:$0xff]   ;;  %v1571_v8 = vld [vmem:[%s1735_s6 + $0x28] ss:$16 sps:$4 sm:$0xff]   ;;  %v1572_v10 = vld [vmem:[%s1735_s6 + $0x44] ss:$16 sps:$4 sm:$0xff]   ;;  %v291_v47 = vmul.f32 %v1405_v21, %v1790_v26  ;;  %v292_v48 = vmul.f32 %v1406_v25, %v1790_v26  ;;  %v293_v55 = vmul.f32 %v1409_v33, %v1790_v26 }
  0x28   : > { %904 = vmatprep.subr.bf16.mxu0 %v1566_v5  ;;  %1017 = vmatprep.subr.bf16.mxu1 %v1568_v6  ;;  %v1574_v12 = vld [vmem:[%s1735_s6 + $0x4c] ss:$16 sps:$4 sm:$0xff]   ;;  %v1576_v13 = vld [vmem:[%s1735_s6 + $0x40] ss:$16 sps:$4 sm:$0xff]   ;;  %v1577_v14 = vld [vmem:[%s1735_s6 + $0x48] ss:$16 sps:$4 sm:$0xff]   ;;  %v1795_v31 = vstv %s1748_s9  ;;  %v294_v59 = vmul.f32 %v1410_v37, %v1790_v26  ;;  %v295_v63 = vmul.f32 %v1413_v40, %v1790_v26  ;;  %v296_v1 = vmul.f32 %v1414_v41, %v1790_v26 }
  0x29   : > { %v1578_v18 = vld [vmem:[%s1735_s6 + $0x64] ss:$16 sps:$4 sm:$0xff]   ;;  %v1580_v20 = vld [vmem:[%s1735_s6 + $0x6c] ss:$16 sps:$4 sm:$0xff]   ;;  %v1582_v24 = vld [vmem:[%s1735_s6 + $0x60] ss:$16 sps:$4 sm:$0xff]   ;;  %v375_v49 = vmul.f32 %v1437_v27, %v1795_v31  ;;  %v376_v50 = vmul.f32 %v1438_v28, %v1795_v31  ;;  %v1820_v54 = vstv %s1774_s24  ;;  %v377_v56 = vmul.f32 %v1441_v34, %v1795_v31 }
  0x2a   : > { %v1583_v29 = vld [vmem:[%s1735_s6 + $0x68] ss:$16 sps:$4 sm:$0xff]   ;;  %v1584_v30 = vld [vmem:[%s1735_s6 + $0x84] ss:$16 sps:$4 sm:$0xff]   ;;  %v1586_v35 = vld [vmem:[%s1735_s6 + $0x8c] ss:$16 sps:$4 sm:$0xff]   ;;  %v378_v60 = vmul.f32 %v1442_v38, %v1795_v31  ;;  %v379_v2 = vmul.f32 %v1445_v42, %v1795_v31  ;;  %v380_v3 = vmul.f32 %v1446_v43, %v1795_v31  ;;  %v492_v6 = vmul.f32 %v1469_v32, %v1820_v54 }
  0x2b   : > { %905 = vmatpush1.bf16.msra.mxu0 %v1570_v7  ;;  %1018 = vmatpush1.bf16.msra.mxu1 %v1571_v8  ;;  %v1588_v45 = vld [vmem:[%s1735_s6 + $0x80] ss:$16 sps:$4 sm:$0xff]   ;;  %v1589_v46 = vld [vmem:[%s1735_s6 + $0x88] ss:$16 sps:$4 sm:$0xff]   ;;  %v1590_v53 = vld [vmem:[%s1735_s6 + $0xa4] ss:$16 sps:$4 sm:$0xff]   ;;  %v391_v4 = vadd.f32 %v375_v49, %v291_v47  ;;  %v392_v5 = vadd.f32 %v376_v50, %v292_v48  ;;  %v493_v7 = vmul.f32 %v1470_v36, %v1820_v54 }
  0x2c   : > { %906 = vmatprep.subr.bf16.mxu0 %v1572_v10  ;;  %1019 = vmatprep.subr.bf16.mxu1 %v1574_v12  ;;  %v1592_v58 = vld [vmem:[%s1735_s6 + $0xac] ss:$16 sps:$4 sm:$0xff]   ;;  %v1594_v9 = vld [vmem:[%s1735_s6 + $0xa0] ss:$16 sps:$4 sm:$0xff]   ;;  %v1595_v10 = vld [vmem:[%s1735_s6 + $0xa8] ss:$16 sps:$4 sm:$0xff]   ;;  %v393_v11 = vadd.f32 %v377_v56, %v293_v55  ;;  %v1417_v12 = vunpack.c.l.bf16 %v1501_v51  ;;  %v394_v17 = vadd.f32 %v378_v60, %v294_v59  ;;  %v495_v19 = vmul.f32 %v1474_v57, %v1820_v54 }
  0x2d   : > { %v1517_v8 = vld [vmem:[%s2254_s2 + $0x98] sm:$0xff]   ;;  %v1596_v15 = vld [vmem:[%s1735_s6 + $0xc4] ss:$16 sps:$4 sm:$0xff]   ;;  %v395_v21 = vadd.f32 %v379_v2, %v295_v63  ;;  %v396_v22 = vadd.f32 %v380_v3, %v296_v1  ;;  %v496_v23 = vmul.f32 %v1477_v61, %v1820_v54  ;;  %v508_v27 = vadd.f32 %v492_v6, %v391_v4  ;;  %v1606_v48 = vld [vmem:[%s1735_s6 + $0xe0] ss:$16 sps:$4 sm:$0xff]  }
  0x2e   : > { %v1598_v16 = vld [vmem:[%s1735_s6 + $0xcc] ss:$16 sps:$4 sm:$0xff]   ;;  %v1502_v25 = vld [vmem:[%s2254_s2 + $0x20] sm:$0xff]   ;;  %v509_v28 = vadd.f32 %v493_v7, %v392_v5  ;;  %v1601_v32 = vld [vmem:[%s1735_s6 + $0xc8] ss:$16 sps:$4 sm:$0xff]   ;;  %v297_v33 = vmul.f32 %v1417_v12, %v1790_v26  ;;  %v1482_v36 = vunpack.c.h.bf16 %v1517_v8  ;;  %v511_v41 = vadd.f32 %v495_v19, %v394_v17 }
  0x2f   : > { %907 = vmatpush1.bf16.msra.mxu0 %v1576_v13  ;;  %1020 = vmatpush1.bf16.msra.mxu1 %v1577_v14  ;;  %v1418_v13 = vunpack.c.h.bf16 %v1501_v51  ;;  %v1449_v14 = vunpack.c.l.bf16 %v1816_v52  ;;  %v1510_v37 = vld [vmem:[%s2254_s2 + $0x60] sm:$0xff]   ;;  %v1421_v43 = vunpack.c.l.bf16 %v1502_v25  ;;  %v1422_v47 = vunpack.c.h.bf16 %v1502_v25  ;;  %v1607_v56 = vld [vmem:[%s1735_s6 + $0xe8] ss:$16 sps:$4 sm:$0xff]   ;;  %v309_v7 = vld [vmem:[%s2255_s3 + $0x10] sm:$0xff] }
  0x30   : > { %908 = vmatprep.subr.bf16.mxu0 %v1578_v18  ;;  %1021 = vmatprep.subr.bf16.mxu1 %v1580_v20  ;;  %v494_v18 = vmul.f32 %v1473_v39, %v1820_v54  ;;  %v1450_v20 = vunpack.c.h.bf16 %v1816_v52  ;;  %v1602_v38 = vld [vmem:[%s1735_s6 + $0xe4] ss:$16 sps:$4 sm:$0xff]   ;;  %v1604_v39 = vld [vmem:[%s1735_s6 + $0xec] ss:$16 sps:$4 sm:$0xff]   ;;  %v573_v49 = vpack.c.bf16 %v509_v28, %v508_v27  ;;  %v1453_v51 = vunpack.c.l.bf16 %v1510_v37 }
  0x31   : > { %v298_v34 = vmul.f32 %v1418_v13, %v1790_v26  ;;  %v1454_v52 = vunpack.c.h.bf16 %v1510_v37  ;;  %v1351_v55 = vld [vmem:[%s2255_s3 + $0x100] sm:$0xff]  ;;  %v323_v59 = vmul.f32 %v307_v44, %v1790_v26  ;;  %v308_v60 = vld [vmem:[%s2255_s3 + $0x8] sm:$0xff]  ;;  %v1884_v1 = vmul.f32 %v1421_v43, %v1790_v26  ;;  %v1353_v13 = vld [vmem:[%s2255_s3 + $0x110] sm:$0xff] }
  0x32   : > { %v510_v40 = vadd.f32 %v494_v18, %v393_v11  ;;  %v382_v42 = vmul.f32 %v1450_v20, %v1795_v31  ;;  %v1320_v61 = vld [vmem:[%s2255_s3 + $0x88] sm:$0xff]  ;;  %v1892_v4 = vmul.f32 %v1422_v47, %v1790_v26  ;;  %v541_v6 = vmul.f32 %v1351_v55, %v1820_v54  ;;  %v1355_v37 = vld [vmem:[%s2255_s3 + $0x120] sm:$0xff]  ;;  %v1358_v43 = vld [vmem:[%s2255_s3 + $0x138] sm:$0xff] }
  0x33   : > { %909 = vmatpush1.bf16.msra.mxu0 %v1582_v24  ;;  %1022 = vmatpush1.bf16.msra.mxu1 %v1583_v29  ;;  %v497_v24 = vmul.f32 %v1478_v62, %v1820_v54  ;;  %v1481_v29 = vunpack.c.l.bf16 %v1517_v8  ;;  %v1352_v2 = vld [vmem:[%s2255_s3 + $0x108] sm:$0xff]  ;;  %v1321_v8 = vld [vmem:[%s2255_s3 + $0x90] sm:$0xff]  ;;  %v324_v11 = vmul.f32 %v308_v60, %v1790_v26  ;;  %v425_v12 = vmul.f32 %v1320_v61, %v1795_v31 }
  0x34   : > { %910 = vmatprep.subr.bf16.mxu0 %v1584_v30  ;;  %1023 = vmatprep.subr.bf16.mxu1 %v1586_v35  ;;  %v1600_v30 = vld [vmem:[%s1735_s6 + $0xc0] ss:$16 sps:$4 sm:$0xff]   ;;  %v381_v35 = vmul.f32 %v1449_v14, %v1795_v31  ;;  %v1881_v62 = vpack.c.bf16 %v511_v41, %v510_v40  ;;  %v398_v63 = vadd.f32 %v382_v42, %v298_v34  ;;  %v310_v14 = vld [vmem:[%s2255_s3 + $0x18] sm:$0xff] }
  0x35   : > { %v498_v50 = vmul.f32 %v1481_v29, %v1820_v54  ;;  %v542_v18 = vmul.f32 %v1352_v2, %v1820_v54  ;;  %v441_v19 = vadd.f32 %v425_v12, %v324_v11  ;;  %v325_v20 = vmul.f32 %v309_v7, %v1790_v26  ;;  %v1324_v29 = vld [vmem:[%s2255_s3 + $0xa8] sm:$0xff]  ;;  %v1326_v42 = vld [vmem:[%s2255_s3 + $0xb8] sm:$0xff]  ;;  %v313_v44 = vld [vmem:[%s2255_s3 + $0x30] sm:$0xff] }
  0x36   : > { %v397_v57 = vadd.f32 %v381_v35, %v297_v33  ;;  %v543_v25 = vmul.f32 %v1353_v13, %v1820_v54  ;;  %v326_v27 = vmul.f32 %v310_v14, %v1790_v26  ;;  %v545_v55 = vmul.f32 %v1355_v37, %v1820_v54  ;;  %v315_v2 = vld [vmem:[%s2255_s3 + $0x40] sm:$0xff]  ;;  %v1332_v37 = vld [vmem:[%s2255_s3 + $0xe8] sm:$0xff] }
  0x37   : > { %911 = vmatpush1.bf16.msra.mxu0 %v1588_v45  ;;  %1024 = vmatpush1.bf16.msra.mxu1 %v1589_v46  ;;  %v512_v45 = vadd.f32 %v496_v23, %v395_v21  ;;  %v513_v46 = vadd.f32 %v497_v24, %v396_v22  ;;  %v426_v21 = vmul.f32 %v1321_v8, %v1795_v31  ;;  %v1354_v22 = vld [vmem:[%s2255_s3 + $0x118] sm:$0xff]  ;;  %v312_v23 = vld [vmem:[%s2255_s3 + $0x28] sm:$0xff]  ;;  %v1359_v13 = vld [vmem:[%s2255_s3 + $0x140] sm:$0xff] }
  0x38   : > { %912 = vmatprep.subr.bf16.mxu0 %v1590_v53  ;;  %1025 = vmatprep.subr.bf16.mxu1 %v1592_v58  ;;  %v1319_v53 = vld [vmem:[%s2255_s3 + $0x80] sm:$0xff]  ;;  %v499_v58 = vmul.f32 %v1482_v36, %v1820_v54  ;;  %v558_v34 = vadd.f32 %v542_v18, %v441_v19  ;;  %v544_v40 = vmul.f32 %v1354_v22, %v1820_v54  ;;  %v318_v19 = vld [vmem:[%s2255_s3 + $0x58] sm:$0xff] }
  0x39   : > { %v1889_v3 = vpack.c.bf16 %v513_v46, %v512_v45  ;;  %v424_v5 = vmul.f32 %v1319_v53, %v1795_v31  ;;  %v442_v35 = vadd.f32 %v426_v21, %v325_v20  ;;  %v1323_v36 = vld [vmem:[%s2255_s3 + $0xa0] sm:$0xff]  ;;  %v328_v41 = vmul.f32 %v312_v23, %v1790_v26  ;;  %v1330_v20 = vld [vmem:[%s2255_s3 + $0xd8] sm:$0xff] }
  0x3a   : > { %v1942_v33 = vadd.f32 %v499_v58, %v398_v63  ;;  %591 = vst.msk [vmem:[#allocation3 + $0x8] sm:$0xff] %vm589_vm0, %v558_v34  ;;  %v429_v46 = vmul.f32 %v1324_v29, %v1795_v31  ;;  %v428_v53 = vmul.f32 %v1323_v36, %v1795_v31  ;;  %v1360_v58 = vld [vmem:[%s2255_s3 + $0x148] sm:$0xff]  ;;  %v431_v60 = vmul.f32 %v1326_v42, %v1795_v31  ;;  %v1362_v21 = vld [vmem:[%s2255_s3 + $0x158] sm:$0xff]  ;;  %v1361_v29 = vld [vmem:[%s2255_s3 + $0x150] sm:$0xff] }
  0x3b   : > { %913 = vmatpush1.bf16.msra.mxu0 %v1594_v9  ;;  %1026 = vmatpush1.bf16.msra.mxu1 %v1595_v10  ;;  %v1903_v9 = vmul.f32 %v1453_v51, %v1795_v31  ;;  %v1906_v10 = vmul.f32 %v1454_v52, %v1795_v31  ;;  %v440_v17 = vadd.f32 %v424_v5, %v323_v59  ;;  %v316_v51 = vld [vmem:[%s2255_s3 + $0x48] sm:$0xff]  ;;  %v1327_v5 = vld [vmem:[%s2255_s3 + $0xc0] sm:$0xff] }
  0x3c   : > { %914 = vmatprep.subr.bf16.mxu0 %v1596_v15  ;;  %1027 = vmatprep.subr.bf16.mxu1 %v1598_v16  ;;  %v1322_v15 = vld [vmem:[%s2255_s3 + $0x98] sm:$0xff]  ;;  %v1919_v16 = vadd.f32 %v498_v50, %v397_v57  ;;  %v559_v45 = vadd.f32 %v543_v25, %v442_v35  ;;  %v1357_v50 = vld [vmem:[%s2255_s3 + $0x130] sm:$0xff]  ;;  %v1328_v57 = vld [vmem:[%s2255_s3 + $0xc8] sm:$0xff]  ;;  %v445_v59 = vadd.f32 %v429_v46, %v328_v41 }
  0x3d   : > { %v557_v24 = vadd.f32 %v541_v6, %v440_v17  ;;  %v427_v28 = vmul.f32 %v1322_v15, %v1795_v31  ;;  %v548_v61 = vmul.f32 %v1358_v43, %v1820_v54  ;;  %v329_v63 = vmul.f32 %v313_v44, %v1790_v26  ;;  %v2002_v6 = vld [vmem:[%s2254_s2 + $0xa0] sm:$0xff]   ;;  %v320_v36 = vld [vmem:[%s2255_s3 + $0x68] sm:$0xff] }
  0x3e   : > { %592 = vst.msk [vmem:[#allocation3 + $0x10] sm:$0xff] %vm589_vm0, %v559_v45  ;;  %v547_v11 = vmul.f32 %v1357_v50, %v1820_v54  ;;  %v332_v12 = vmul.f32 %v316_v51, %v1790_v26  ;;  %v433_v17 = vmul.f32 %v1328_v57, %v1795_v31  ;;  %v550_v18 = vmul.f32 %v1360_v58, %v1820_v54  ;;  %v1364_v41 = vld [vmem:[%s2255_s3 + $0x168] sm:$0xff]  ;;  %v319_v42 = vld [vmem:[%s2255_s3 + $0x60] sm:$0xff]  ;;  %v1334_v50 = vld [vmem:[%s2255_s3 + $0xf8] sm:$0xff] }
  0x3f   : > { %915 = vmatpush1.bf16.msra.mxu0 %v1600_v30  ;;  %1028 = vmatpush1.bf16.msra.mxu1 %v1601_v32  ;;  %v1356_v30 = vld [vmem:[%s2255_s3 + $0x128] sm:$0xff]  ;;  %v311_v32 = vld [vmem:[%s2255_s3 + $0x20] sm:$0xff]  ;;  %590 = vst.msk [vmem:[#allocation3] sm:$0xff] %vm589_vm0, %v557_v24  ;;  %v331_v24 = vmul.f32 %v315_v2, %v1790_v26  ;;  %v432_v25 = vmul.f32 %v1327_v5, %v1795_v31  ;;  %v1366_v58 = vld [vmem:[%s2255_s3 + $0x178] sm:$0xff] }
  0x40   : > { %916 = vmatprep.subr.bf16.mxu0 %v1602_v38  ;;  %1029 = vmatprep.subr.bf16.mxu1 %v1604_v39  ;;  %v314_v38 = vld [vmem:[%s2255_s3 + $0x38] sm:$0xff]  ;;  %v443_v39 = vadd.f32 %v427_v28, %v326_v27  ;;  %v546_v47 = vmul.f32 %v1356_v30, %v1820_v54  ;;  %v317_v27 = vld [vmem:[%s2255_s3 + $0x50] sm:$0xff]  ;;  %v449_v34 = vadd.f32 %v433_v17, %v332_v12  ;;  %v1331_v43 = vld [vmem:[%s2255_s3 + $0xe0] sm:$0xff] }
  0x41   : > { %v1329_v28 = vld [vmem:[%s2255_s3 + $0xd0] sm:$0xff]  ;;  %v549_v35 = vmul.f32 %v1359_v13, %v1820_v54  ;;  %v435_v45 = vmul.f32 %v1330_v20, %v1795_v31  ;;  %v552_v46 = vmul.f32 %v1362_v21, %v1820_v54  ;;  %v647_v51 = vld [vmem:[#allocation3 + $0x8] sm:$0xff]  ;;  %v336_v57 = vmul.f32 %v320_v36, %v1790_v26 }
  0x42   : > { %v560_v52 = vadd.f32 %v544_v40, %v443_v39  ;;  %v562_v14 = vadd.f32 %v546_v47, %v445_v59  ;;  %v448_v39 = vadd.f32 %v432_v25, %v331_v24  ;;  %v334_v40 = vmul.f32 %v318_v19, %v1790_v26  ;;  %v321_v2 = vld [vmem:[%s2255_s3 + $0x70] sm:$0xff]  ;;  %v1503_v19 = vld [vmem:[%s2254_s2 + $0x28] sm:$0xff]  }
  0x43   : > { %917 = vmatpush1.bf16.msra.mxu0 %v1606_v48  ;;  %1030 = vmatpush1.bf16.msra.mxu1 %v1607_v56  ;;  %v327_v48 = vmul.f32 %v311_v32, %v1790_v26  ;;  %v330_v56 = vmul.f32 %v314_v38, %v1790_v26  ;;  %v566_v44 = vadd.f32 %v550_v18, %v449_v34  ;;  %v1333_v5 = vld [vmem:[%s2255_s3 + $0xf0] sm:$0xff]  ;;  %v1511_v20 = vld [vmem:[%s2254_s2 + $0x68] sm:$0xff]   ;;  %v1425_v36 = vunpack.c.l.bf16 %v1503_v19 }
  0x44   : > { %593 = vst.msk [vmem:[#allocation3 + $0x18] sm:$0xff] %vm589_vm0, %v560_v52  ;;  %595 = vst.msk [vmem:[#allocation3 + $0x28] sm:$0xff] %vm589_vm0, %v562_v14  ;;  %v333_v47 = vmul.f32 %v317_v27, %v1790_v26  ;;  %v451_v59 = vadd.f32 %v435_v45, %v334_v40  ;;  %v1365_v13 = vld [vmem:[%s2255_s3 + $0x170] sm:$0xff]  ;;  %v439_v17 = vmul.f32 %v1334_v50, %v1795_v31  ;;  %v1486_v27 = vunpack.c.h.bf16 %v2002_v6 }
  0x45   : > { %v444_v7 = vadd.f32 %v428_v53, %v327_v48  ;;  %v447_v15 = vadd.f32 %v431_v60, %v330_v56  ;;  %v1363_v48 = vld [vmem:[%s2255_s3 + $0x160] sm:$0xff]  ;;  %v648_v52 = vld [vmem:[#allocation3 + $0x10] sm:$0xff]  ;;  %v565_v53 = vadd.f32 %v549_v35, %v448_v39  ;;  %v551_v56 = vmul.f32 %v1361_v29, %v1820_v54  ;;  %599 = vst.msk [vmem:[#allocation3 + $0x48] sm:$0xff] %vm589_vm0, %v566_v44 }
  0x46   : > { %935 = vmatmul.mubr.bf16.vlgmr.msra.gmra.mrb[0].mxu0 %v573_v49  ;;  %1048 = vmatmul.mubr.bf16.vlgmr.msra.gmra.mrb[0].mxu1 %v573_v49  ;;  %v1325_v49 = vld [vmem:[%s2255_s3 + $0xb0] sm:$0xff]  ;;  %v646_v30 = vld [vmem:[#allocation3] sm:$0xff]  ;;  %v437_v60 = vmul.f32 %v1332_v37, %v1795_v31  ;;  %v568_v14 = vadd.f32 %v552_v46, %v451_v59  ;;  %v556_v18 = vmul.f32 %v1366_v58, %v1820_v54  ;;  %v1457_v37 = vunpack.c.l.bf16 %v1511_v20 }
  0x47   : > { %944 = vmatprep.mubr.bf16.mxu0 %v1652_v0  ;;  %1057 = vmatprep.mubr.bf16.mxu1 %v1652_v0  ;;  %v430_v8 = vmul.f32 %v1325_v49, %v1795_v31  ;;  %v561_v22 = vadd.f32 %v545_v55, %v444_v7  ;;  %v564_v32 = vadd.f32 %v548_v61, %v447_v15  ;;  %v322_v49 = vld [vmem:[%s2255_s3 + $0x78] sm:$0xff]  ;;  %v1426_v39 = vunpack.c.h.bf16 %v1503_v19 }
  0x48   : > { %664 = vperm.xlu0 %1558, %v646_v30   ;;  %v434_v55 = vmul.f32 %v1329_v28, %v1795_v31  ;;  %674 = vperm.xlu1 %1559, %v648_v52   ;;  %v554_v61 = vmul.f32 %v1364_v41, %v1820_v54  ;;  %598 = vst.msk [vmem:[#allocation3 + $0x40] sm:$0xff] %vm589_vm0, %v565_v53  ;;  %601 = vst.msk [vmem:[#allocation3 + $0x58] sm:$0xff] %vm589_vm0, %v568_v14  ;;  %v1458_v40 = vunpack.c.h.bf16 %v1511_v20  ;;  %v1519_v41 = vld [vmem:[%s2254_s2 + $0xa8] sm:$0xff]   ;;  %v1512_v52 = vld [vmem:[%s2254_s2 + $0x70] sm:$0xff]  }
  0x49   : > { %v446_v23 = vadd.f32 %v430_v8, %v329_v63  ;;  %594 = vst.msk [vmem:[#allocation3 + $0x20] sm:$0xff] %vm589_vm0, %v561_v22  ;;  %597 = vst.msk [vmem:[#allocation3 + $0x38] sm:$0xff] %vm589_vm0, %v564_v32  ;;  %v335_v63 = vmul.f32 %v319_v42, %v1790_v26  ;;  %v436_v8 = vmul.f32 %v1331_v43, %v1795_v31  ;;  %v1461_v59 = vunpack.c.l.bf16 %v1512_v52 }
  0x4a   : > { %v450_v7 = vadd.f32 %v434_v55, %v333_v47  ;;  %v338_v12 = vmul.f32 %v322_v49, %v1790_v26  ;;  %v453_v15 = vadd.f32 %v437_v60, %v336_v57  ;;  %v337_v24 = vmul.f32 %v321_v2, %v1790_v26 }
  0x4b   : > { %v563_v38 = vadd.f32 %v547_v11, %v446_v23  ;;  %v553_v11 = vmul.f32 %v1363_v48, %v1820_v54  ;;  %v649_v21 = vld [vmem:[#allocation3 + $0x18] sm:$0xff]  ;;  %v452_v23 = vadd.f32 %v436_v8, %v335_v63  ;;  %v438_v25 = vmul.f32 %v1333_v5, %v1795_v31  ;;  %v651_v42 = vld [vmem:[#allocation3 + $0x28] sm:$0xff] }
  0x4c   : > { %669 = vperm.xlu0 %1558, %v647_v51   ;;  %v567_v22 = vadd.f32 %v551_v56, %v450_v7  ;;  %v570_v29 = vadd.f32 %v554_v61, %v453_v15  ;;  %v455_v30 = vadd.f32 %v439_v17, %v338_v12  ;;  %v555_v32 = vmul.f32 %v1365_v13, %v1820_v54  ;;  %v1504_v51 = vld [vmem:[%s2254_s2 + $0x30] sm:$0xff]   ;;  %v655_v60 = vld [vmem:[#allocation3 + $0x48] sm:$0xff]  ;;  %v1505_v15 = vld [vmem:[%s2254_s2 + $0x38] sm:$0xff]  }
  0x4d   : > { %596 = vst.msk [vmem:[#allocation3 + $0x30] sm:$0xff] %vm589_vm0, %v563_v38  ;;  %v569_v34 = vadd.f32 %v553_v11, %v452_v23  ;;  %v454_v35 = vadd.f32 %v438_v25, %v337_v24  ;;  %679 = vperm.xlu1 %1559, %v649_v21   ;;  %v576_v45 = vpack.c.bf16 %v1942_v33, %v1919_v16  ;;  %v1489_v49 = vunpack.c.l.bf16 %v1519_v41  ;;  %v1520_v7 = vld [vmem:[%s2254_s2 + $0xb0] sm:$0xff]  }
  0x4e   : > { %945 = vmatmul.mubr.bf16.gmra.mrb[4].mxu0 %v1881_v62  ;;  %1058 = vmatmul.mubr.bf16.gmra.mrb[4].mxu1 %v1881_v62  ;;  %v1485_v62 = vunpack.c.l.bf16 %v2002_v6  ;;  %600 = vst.msk [vmem:[#allocation3 + $0x50] sm:$0xff] %vm589_vm0, %v567_v22  ;;  %603 = vst.msk [vmem:[#allocation3 + $0x68] sm:$0xff] %vm589_vm0, %v570_v29  ;;  %v399_v46 = vadd.f32 %v1903_v9, %v1884_v1  ;;  %v400_v6 = vadd.f32 %v1906_v10, %v1892_v4  ;;  %v1513_v22 = vld [vmem:[%s2254_s2 + $0x78] sm:$0xff]  }
  0x4f   : > { %954 = vmatprep.mubr.bf16.mxu0 %v1652_v0  ;;  %1067 = vmatprep.mubr.bf16.mxu1 %v1652_v0  ;;  %602 = vst.msk [vmem:[#allocation3 + $0x60] sm:$0xff] %vm589_vm0, %v569_v34  ;;  %v571_v44 = vadd.f32 %v555_v32, %v454_v35  ;;  %v301_v47 = vmul.f32 %v1425_v36, %v1790_v26  ;;  %v1490_v9 = vunpack.c.h.bf16 %v1519_v41  ;;  %v654_v4 = vld [vmem:[#allocation3 + $0x40] sm:$0xff]  ;;  %v1429_v58 = vunpack.c.l.bf16 %v1504_v51  ;;  %v657_v17 = vld [vmem:[#allocation3 + $0x58] sm:$0xff] }
  0x50   : > { %v650_v28 = vld [vmem:[#allocation3 + $0x20] sm:$0xff]  ;;  %v500_v38 = vmul.f32 %v1485_v62, %v1820_v54  ;;  %v501_v62 = vmul.f32 %v1486_v27, %v1820_v54  ;;  %v385_v48 = vmul.f32 %v1457_v37, %v1795_v31  ;;  %v302_v16 = vmul.f32 %v1426_v39, %v1790_v26  ;;  %v653_v33 = vld [vmem:[#allocation3 + $0x38] sm:$0xff] }
  0x51   : > { %684 = vperm.xlu0 %1558, %v650_v28   ;;  %604 = vst.msk [vmem:[#allocation3 + $0x70] sm:$0xff] %vm589_vm0, %v571_v44  ;;  %689 = vperm.xlu1 %1559, %v651_v42   ;;  %v386_v1 = vmul.f32 %v1458_v40, %v1795_v31  ;;  %v502_v55 = vmul.f32 %v1489_v49, %v1820_v54  ;;  %v1430_v2 = vunpack.c.h.bf16 %v1504_v51  ;;  %v1462_v5 = vunpack.c.h.bf16 %v1512_v52  ;;  %v1521_v37 = vld [vmem:[%s2254_s2 + $0xb8] sm:$0xff]  }
  0x52   : > { %v516_v10 = vadd.f32 %v500_v38, %v399_v46  ;;  %v517_v50 = vadd.f32 %v501_v62, %v400_v6  ;;  %v401_v53 = vadd.f32 %v385_v48, %v301_v47  ;;  %v503_v57 = vmul.f32 %v1490_v9, %v1820_v54 }
  0x53   : > { %v402_v56 = vadd.f32 %v386_v1, %v302_v16  ;;  %v303_v12 = vmul.f32 %v1429_v58, %v1790_v26  ;;  %v387_v13 = vmul.f32 %v1461_v59, %v1795_v31  ;;  %v1493_v14 = vunpack.c.l.bf16 %v1520_v7 }
  0x54   : > { %v652_v43 = vld [vmem:[#allocation3 + $0x30] sm:$0xff]  ;;  %v577_v63 = vpack.c.bf16 %v517_v50, %v516_v10  ;;  %v518_v8 = vadd.f32 %v502_v55, %v401_v53  ;;  %v304_v19 = vmul.f32 %v1430_v2, %v1790_v26  ;;  %v388_v20 = vmul.f32 %v1462_v5, %v1795_v31 }
  0x55   : > { %694 = vperm.xlu0 %1558, %v652_v43   ;;  %699 = vperm.xlu1 %1559, %v653_v33   ;;  %v656_v61 = vld [vmem:[#allocation3 + $0x50] sm:$0xff]  ;;  %v519_v11 = vadd.f32 %v503_v57, %v402_v56  ;;  %v1494_v21 = vunpack.c.h.bf16 %v1520_v7  ;;  %v1433_v23 = vunpack.c.l.bf16 %v1505_v15  ;;  %v403_v25 = vadd.f32 %v387_v13, %v303_v12  ;;  %v659_v29 = vld [vmem:[#allocation3 + $0x68] sm:$0xff] }
  0x56   : > { %955 = vmatmul.mubr.bf16.gmra.mrb[8].mxu0 %v1889_v3  ;;  %1068 = vmatmul.mubr.bf16.gmra.mrb[8].mxu1 %v1889_v3  ;;  %v572_v3 = vadd.f32 %v556_v18, %v455_v30  ;;  %v658_v18 = vld [vmem:[#allocation3 + $0x60] sm:$0xff]  ;;  %v504_v27 = vmul.f32 %v1493_v14, %v1820_v54  ;;  %v1434_v28 = vunpack.c.h.bf16 %v1505_v15  ;;  %v404_v32 = vadd.f32 %v388_v20, %v304_v19 }
  0x57   : > { %964 = vmatprep.mubr.bf16.mxu0 %v1652_v0  ;;  %1077 = vmatprep.mubr.bf16.mxu1 %v1652_v0  ;;  %v578_v24 = vpack.c.bf16 %v519_v11, %v518_v8  ;;  %v505_v34 = vmul.f32 %v1494_v21, %v1820_v54  ;;  %v1465_v35 = vunpack.c.l.bf16 %v1513_v22  ;;  %v1466_v36 = vunpack.c.h.bf16 %v1513_v22 }
  0x58   : > { %605 = vst.msk [vmem:[#allocation3 + $0x78] sm:$0xff] %vm589_vm0, %v572_v3  ;;  %v660_v30 = vld [vmem:[#allocation3 + $0x70] sm:$0xff]  ;;  %v520_v3 = vadd.f32 %v504_v27, %v403_v25  ;;  %v305_v38 = vmul.f32 %v1433_v23, %v1790_v26  ;;  %v306_v39 = vmul.f32 %v1434_v28, %v1790_v26  ;;  %v1497_v40 = vunpack.c.l.bf16 %v1521_v37 }
  0x59   : > { %704 = vperm.xlu0 %1558, %v654_v4   ;;  %709 = vperm.xlu1 %1559, %v655_v60   ;;  %v521_v42 = vadd.f32 %v505_v34, %v404_v32  ;;  %v389_v43 = vmul.f32 %v1465_v35, %v1795_v31  ;;  %v390_v44 = vmul.f32 %v1466_v36, %v1795_v31 }
  0x5a   : > { %v506_v46 = vmul.f32 %v1497_v40, %v1820_v54 }
  0x5b   : > { %v579_v6 = vpack.c.bf16 %v521_v42, %v520_v3  ;;  %v405_v26 = vadd.f32 %v389_v43, %v305_v38  ;;  %v406_v62 = vadd.f32 %v390_v44, %v306_v39 }
  0x5d   : > { %714 = vperm.xlu0 %1558, %v656_v61   ;;  %719 = vperm.xlu1 %1559, %v657_v17   ;;  %v522_v48 = vadd.f32 %v506_v46, %v405_v26 }
  0x5e   : > { %965 = vmatmul.mubr.bf16.gmra.mrb[12].mxu0 %v576_v45  ;;  %1078 = vmatmul.mubr.bf16.gmra.mrb[12].mxu1 %v576_v45  ;;  %v1498_v45 = vunpack.c.h.bf16 %v1521_v37 }
  0x5f   : > { %974 = vmatprep.mubr.bf16.mxu0 %v1652_v0  ;;  %1087 = vmatprep.mubr.bf16.mxu1 %v1652_v0  ;;  %v661_v41 = vld [vmem:[#allocation3 + $0x78] sm:$0xff] }
  0x60   : > { %v507_v47 = vmul.f32 %v1498_v45, %v1820_v54 }
  0x61   : > { %724 = vperm.xlu0 %1558, %v658_v18   ;;  %729 = vperm.xlu1 %1559, %v659_v29  }
  0x62   : > { %v523_v49 = vadd.f32 %v507_v47, %v406_v62 }
  0x64   : > { %v580_v31 = vpack.c.bf16 %v523_v49, %v522_v48 }
  0x65   : > { %734 = vperm.xlu0 %1558, %v660_v30   ;;  %739 = vperm.xlu1 %1559, %v661_v41  }
  0x66   : > { %975 = vmatmul.mubr.bf16.gmra.mrb[16].mxu0 %v577_v63  ;;  %1088 = vmatmul.mubr.bf16.gmra.mrb[16].mxu1 %v577_v63 }
  0x67   : > { %984 = vmatprep.mubr.bf16.mxu0 %v1652_v0  ;;  %1097 = vmatprep.mubr.bf16.mxu1 %v1652_v0 }
  0x6e   : > { %985 = vmatmul.mubr.bf16.gmra.mrb[20].mxu0 %v578_v24  ;;  %1098 = vmatmul.mubr.bf16.gmra.mrb[20].mxu1 %v578_v24 }
  0x6f   : > { %994 = vmatprep.mubr.bf16.mxu0 %v1652_v0  ;;  %1107 = vmatprep.mubr.bf16.mxu1 %v1652_v0 }
  0x76   : > { %995 = vmatmul.mubr.bf16.gmra.mrb[24].mxu0 %v579_v6  ;;  %1108 = vmatmul.mubr.bf16.gmra.mrb[24].mxu1 %v579_v6 }
  0x77   : > { %1004 = vmatprep.mubr.bf16.mxu0 %v1652_v0  ;;  %1117 = vmatprep.mubr.bf16.mxu1 %v1652_v0 }
  0x7e   : > { %1005 = vmatmul.mubr.bf16.gmra.mrb[28].mxu0 %v580_v31  ;;  %1118 = vmatmul.mubr.bf16.gmra.mrb[28].mxu1 %v580_v31 }
  0xc7   : > { %v665_v16 = vpop.permute.xlu0 %664  ;;  %v675_v9 = vpop.permute.xlu1 %674 }
  0xcb   : > { %v670_v1 = vpop.permute.xlu0 %669 }
  0xcc   : > { %v680_v63 = vpop.permute.xlu1 %679 }
  0xd0   : > { %v690_v24 = vpop.permute.xlu1 %689  ;;  %v685_v25 = vpop.permute.xlu0 %684 }
  0xd4   : > { %v700_v44 = vpop.permute.xlu1 %699  ;;  %v695_v45 = vpop.permute.xlu0 %694 }
 0x119   : > { %v936_v54 = vpop.f32.mrb[0].mxu0  ;;  %v1049_v33 = vpop.f32.mrb[0].mxu1 }
 0x11a   : > { %v937_v4 = vadd.f32 %v936_v54, %v665_v16  ;;  %v1050_v0 = vadd.f32 %v1049_v33, %v665_v16  ;;  %v938_v10 = vpop.f32.mrb[1].mxu0  ;;  %v1051_v50 = vpop.f32.mrb[1].mxu1 }
 0x11b   : > { %v939_v51 = vadd.f32 %v938_v10, %v665_v16  ;;  %v1052_v52 = vadd.f32 %v1051_v50, %v665_v16  ;;  %v940_v53 = vpop.f32.mrb[2].mxu0  ;;  %v1053_v55 = vpop.f32.mrb[2].mxu1 }
 0x11c   : > { %1128 = vst [vmem:[%s2177_s7] sm:$0xff] %v937_v4  ;;  %1130 = vst [vmem:[%s2177_s7 + $0x10] sm:$0xff] %v1050_v0  ;;  %v941_v56 = vadd.f32 %v940_v53, %v670_v1  ;;  %v1054_v57 = vadd.f32 %v1053_v55, %v670_v1  ;;  %v942_v58 = vpop.f32.mrb[3].mxu0  ;;  %v1055_v59 = vpop.f32.mrb[3].mxu1 }
 0x11d   : > { %1129 = vst [vmem:[%s2177_s7 + $0x8] sm:$0xff] %v939_v51  ;;  %1131 = vst [vmem:[%s2177_s7 + $0x18] sm:$0xff] %v1052_v52  ;;  %v943_v60 = vadd.f32 %v942_v58, %v670_v1  ;;  %v1056_v61 = vadd.f32 %v1055_v59, %v670_v1  ;;  %v710_v50 = vpop.permute.xlu1 %709  ;;  %v705_v51 = vpop.permute.xlu0 %704 }
 0x11e   : > { %1132 = vst [vmem:[%s2177_s7 + $0x20] sm:$0xff] %v941_v56  ;;  %1134 = vst [vmem:[%s2177_s7 + $0x30] sm:$0xff] %v1054_v57 }
 0x11f   : > { %1133 = vst [vmem:[%s2177_s7 + $0x28] sm:$0xff] %v943_v60  ;;  %1135 = vst [vmem:[%s2177_s7 + $0x38] sm:$0xff] %v1056_v61 }
 0x121   : > { %v946_v2 = vpop.f32.mrb[4].mxu0  ;;  %v1059_v5 = vpop.f32.mrb[4].mxu1 }
 0x122   : > { %v947_v7 = vadd.f32 %v946_v2, %v675_v9  ;;  %v1060_v8 = vadd.f32 %v1059_v5, %v675_v9  ;;  %v948_v11 = vpop.f32.mrb[5].mxu0  ;;  %v1061_v12 = vpop.f32.mrb[5].mxu1 }
 0x123   : > { %v949_v13 = vadd.f32 %v948_v11, %v675_v9  ;;  %v1062_v14 = vadd.f32 %v1061_v12, %v675_v9  ;;  %v950_v15 = vpop.f32.mrb[6].mxu0  ;;  %v1063_v17 = vpop.f32.mrb[6].mxu1 }
 0x124   : > { %1136 = vst [vmem:[%s2177_s7 + $0x40] sm:$0xff] %v947_v7  ;;  %1138 = vst [vmem:[%s2177_s7 + $0x50] sm:$0xff] %v1060_v8  ;;  %v951_v18 = vadd.f32 %v950_v15, %v680_v63  ;;  %v1064_v19 = vadd.f32 %v1063_v17, %v680_v63  ;;  %v952_v20 = vpop.f32.mrb[7].mxu0  ;;  %v1065_v21 = vpop.f32.mrb[7].mxu1 }
 0x125   : > { %1137 = vst [vmem:[%s2177_s7 + $0x48] sm:$0xff] %v949_v13  ;;  %1139 = vst [vmem:[%s2177_s7 + $0x58] sm:$0xff] %v1062_v14  ;;  %v953_v22 = vadd.f32 %v952_v20, %v680_v63  ;;  %v1066_v23 = vadd.f32 %v1065_v21, %v680_v63  ;;  %v720_v13 = vpop.permute.xlu1 %719  ;;  %v715_v14 = vpop.permute.xlu0 %714 }
 0x126   : > { %1140 = vst [vmem:[%s2177_s7 + $0x60] sm:$0xff] %v951_v18  ;;  %1142 = vst [vmem:[%s2177_s7 + $0x70] sm:$0xff] %v1064_v19 }
 0x127   : > { %1141 = vst [vmem:[%s2177_s7 + $0x68] sm:$0xff] %v953_v22  ;;  %1143 = vst [vmem:[%s2177_s7 + $0x78] sm:$0xff] %v1066_v23 }
 0x129   : > { %v956_v27 = vpop.f32.mrb[8].mxu0  ;;  %v1069_v28 = vpop.f32.mrb[8].mxu1 }
 0x12a   : > { %v957_v29 = vadd.f32 %v956_v27, %v685_v25  ;;  %v1070_v30 = vadd.f32 %v1069_v28, %v685_v25  ;;  %v958_v32 = vpop.f32.mrb[9].mxu0  ;;  %v1071_v34 = vpop.f32.mrb[9].mxu1 }
 0x12b   : > { %v959_v35 = vadd.f32 %v958_v32, %v685_v25  ;;  %v1072_v36 = vadd.f32 %v1071_v34, %v685_v25  ;;  %v960_v37 = vpop.f32.mrb[10].mxu0  ;;  %v1073_v3 = vpop.f32.mrb[10].mxu1 }
 0x12c   : > { %1144 = vst [vmem:[%s2177_s7 + $0x80] sm:$0xff] %v957_v29  ;;  %1146 = vst [vmem:[%s2177_s7 + $0x90] sm:$0xff] %v1070_v30  ;;  %v961_v38 = vadd.f32 %v960_v37, %v690_v24  ;;  %v1074_v39 = vadd.f32 %v1073_v3, %v690_v24  ;;  %v962_v40 = vpop.f32.mrb[11].mxu0  ;;  %v1075_v41 = vpop.f32.mrb[11].mxu1 }
 0x12d   : > { %1145 = vst [vmem:[%s2177_s7 + $0x88] sm:$0xff] %v959_v35  ;;  %1147 = vst [vmem:[%s2177_s7 + $0x98] sm:$0xff] %v1072_v36  ;;  %v963_v42 = vadd.f32 %v962_v40, %v690_v24  ;;  %v1076_v43 = vadd.f32 %v1075_v41, %v690_v24  ;;  %v730_v35 = vpop.permute.xlu1 %729  ;;  %v725_v36 = vpop.permute.xlu0 %724 }
 0x12e   : > { %1148 = vst [vmem:[%s2177_s7 + $0xa0] sm:$0xff] %v961_v38  ;;  %1150 = vst [vmem:[%s2177_s7 + $0xb0] sm:$0xff] %v1074_v39 }
 0x12f   : > { %1149 = vst [vmem:[%s2177_s7 + $0xa8] sm:$0xff] %v963_v42  ;;  %1151 = vst [vmem:[%s2177_s7 + $0xb8] sm:$0xff] %v1076_v43 }
 0x131   : > { %v966_v46 = vpop.f32.mrb[12].mxu0  ;;  %v1079_v6 = vpop.f32.mrb[12].mxu1 }
 0x132   : > { %v967_v26 = vadd.f32 %v966_v46, %v695_v45  ;;  %v1080_v62 = vadd.f32 %v1079_v6, %v695_v45  ;;  %v968_v47 = vpop.f32.mrb[13].mxu0  ;;  %v1081_v48 = vpop.f32.mrb[13].mxu1 }
 0x133   : > { %v969_v49 = vadd.f32 %v968_v47, %v695_v45  ;;  %v1082_v31 = vadd.f32 %v1081_v48, %v695_v45  ;;  %v970_v16 = vpop.f32.mrb[14].mxu0  ;;  %v1083_v1 = vpop.f32.mrb[14].mxu1 }
 0x134   : > { %1152 = vst [vmem:[%s2177_s7 + $0xc0] sm:$0xff] %v967_v26  ;;  %1154 = vst [vmem:[%s2177_s7 + $0xd0] sm:$0xff] %v1080_v62  ;;  %v971_v9 = vadd.f32 %v970_v16, %v700_v44  ;;  %v1084_v54 = vadd.f32 %v1083_v1, %v700_v44  ;;  %v972_v33 = vpop.f32.mrb[15].mxu0  ;;  %v1085_v4 = vpop.f32.mrb[15].mxu1 }
 0x135   : > { %1153 = vst [vmem:[%s2177_s7 + $0xc8] sm:$0xff] %v969_v49  ;;  %1155 = vst [vmem:[%s2177_s7 + $0xd8] sm:$0xff] %v1082_v31  ;;  %v973_v0 = vadd.f32 %v972_v33, %v700_v44  ;;  %v1086_v10 = vadd.f32 %v1085_v4, %v700_v44  ;;  %v740_v49 = vpop.permute.xlu1 %739  ;;  %v735_v31 = vpop.permute.xlu0 %734 }
 0x136   : > { %1156 = vst [vmem:[%s2177_s7 + $0xe0] sm:$0xff] %v971_v9  ;;  %1158 = vst [vmem:[%s2177_s7 + $0xf0] sm:$0xff] %v1084_v54 }
 0x137   : > { %1157 = vst [vmem:[%s2177_s7 + $0xe8] sm:$0xff] %v973_v0  ;;  %1159 = vst [vmem:[%s2177_s7 + $0xf8] sm:$0xff] %v1086_v10 }
 0x139   : > { %v976_v52 = vpop.f32.mrb[16].mxu0  ;;  %v1089_v53 = vpop.f32.mrb[16].mxu1 }
 0x13a   : > { %v977_v55 = vadd.f32 %v976_v52, %v705_v51  ;;  %v1090_v56 = vadd.f32 %v1089_v53, %v705_v51  ;;  %v978_v57 = vpop.f32.mrb[17].mxu0  ;;  %v1091_v58 = vpop.f32.mrb[17].mxu1 }
 0x13b   : > { %v979_v59 = vadd.f32 %v978_v57, %v705_v51  ;;  %v1092_v60 = vadd.f32 %v1091_v58, %v705_v51  ;;  %v980_v61 = vpop.f32.mrb[18].mxu0  ;;  %v1093_v63 = vpop.f32.mrb[18].mxu1 }
 0x13c   : > { %1160 = vst [vmem:[%s2177_s7 + $0x100] sm:$0xff] %v977_v55  ;;  %1162 = vst [vmem:[%s2177_s7 + $0x110] sm:$0xff] %v1090_v56  ;;  %v981_v2 = vadd.f32 %v980_v61, %v710_v50  ;;  %v1094_v5 = vadd.f32 %v1093_v63, %v710_v50  ;;  %v982_v7 = vpop.f32.mrb[19].mxu0  ;;  %v1095_v8 = vpop.f32.mrb[19].mxu1 }
 0x13d   : > { %1161 = vst [vmem:[%s2177_s7 + $0x108] sm:$0xff] %v979_v59  ;;  %1163 = vst [vmem:[%s2177_s7 + $0x118] sm:$0xff] %v1092_v60  ;;  %v983_v11 = vadd.f32 %v982_v7, %v710_v50  ;;  %v1096_v12 = vadd.f32 %v1095_v8, %v710_v50 }
 0x13e   : > { %1164 = vst [vmem:[%s2177_s7 + $0x120] sm:$0xff] %v981_v2  ;;  %1166 = vst [vmem:[%s2177_s7 + $0x130] sm:$0xff] %v1094_v5 }
 0x13f   : > { %1165 = vst [vmem:[%s2177_s7 + $0x128] sm:$0xff] %v983_v11  ;;  %1167 = vst [vmem:[%s2177_s7 + $0x138] sm:$0xff] %v1096_v12 }
 0x141   : > { %v986_v15 = vpop.f32.mrb[20].mxu0  ;;  %v1099_v17 = vpop.f32.mrb[20].mxu1 }
 0x142   : > { %v987_v18 = vadd.f32 %v986_v15, %v715_v14  ;;  %v1100_v19 = vadd.f32 %v1099_v17, %v715_v14  ;;  %v988_v20 = vpop.f32.mrb[21].mxu0  ;;  %v1101_v21 = vpop.f32.mrb[21].mxu1 }
 0x143   : > { %v989_v22 = vadd.f32 %v988_v20, %v715_v14  ;;  %v1102_v23 = vadd.f32 %v1101_v21, %v715_v14  ;;  %v990_v24 = vpop.f32.mrb[22].mxu0  ;;  %v1103_v25 = vpop.f32.mrb[22].mxu1 }
 0x144   : > { %1168 = vst [vmem:[%s2177_s7 + $0x140] sm:$0xff] %v987_v18  ;;  %1170 = vst [vmem:[%s2177_s7 + $0x150] sm:$0xff] %v1100_v19  ;;  %v991_v27 = vadd.f32 %v990_v24, %v720_v13  ;;  %v1104_v28 = vadd.f32 %v1103_v25, %v720_v13  ;;  %v992_v29 = vpop.f32.mrb[23].mxu0  ;;  %v1105_v30 = vpop.f32.mrb[23].mxu1 }
 0x145   : > { %1169 = vst [vmem:[%s2177_s7 + $0x148] sm:$0xff] %v989_v22  ;;  %1171 = vst [vmem:[%s2177_s7 + $0x158] sm:$0xff] %v1102_v23  ;;  %v993_v32 = vadd.f32 %v992_v29, %v720_v13  ;;  %v1106_v34 = vadd.f32 %v1105_v30, %v720_v13 }
 0x146   : > { %1172 = vst [vmem:[%s2177_s7 + $0x160] sm:$0xff] %v991_v27  ;;  %1174 = vst [vmem:[%s2177_s7 + $0x170] sm:$0xff] %v1104_v28 }
 0x147   : > { %1173 = vst [vmem:[%s2177_s7 + $0x168] sm:$0xff] %v993_v32  ;;  %1175 = vst [vmem:[%s2177_s7 + $0x178] sm:$0xff] %v1106_v34 }
 0x149   : > { %v996_v37 = vpop.f32.mrb[24].mxu0  ;;  %v1109_v3 = vpop.f32.mrb[24].mxu1 }
 0x14a   : > { %v997_v38 = vadd.f32 %v996_v37, %v725_v36  ;;  %v1110_v39 = vadd.f32 %v1109_v3, %v725_v36  ;;  %v998_v40 = vpop.f32.mrb[25].mxu0  ;;  %v1111_v41 = vpop.f32.mrb[25].mxu1 }
 0x14b   : > { %v999_v42 = vadd.f32 %v998_v40, %v725_v36  ;;  %v1112_v43 = vadd.f32 %v1111_v41, %v725_v36  ;;  %v1000_v44 = vpop.f32.mrb[26].mxu0  ;;  %v1113_v45 = vpop.f32.mrb[26].mxu1 }
 0x14c   : > { %1176 = vst [vmem:[%s2177_s7 + $0x180] sm:$0xff] %v997_v38  ;;  %1178 = vst [vmem:[%s2177_s7 + $0x190] sm:$0xff] %v1110_v39  ;;  %v1001_v46 = vadd.f32 %v1000_v44, %v730_v35  ;;  %v1114_v6 = vadd.f32 %v1113_v45, %v730_v35  ;;  %v1002_v26 = vpop.f32.mrb[27].mxu0  ;;  %v1115_v62 = vpop.f32.mrb[27].mxu1 }
 0x14d   : > { %1177 = vst [vmem:[%s2177_s7 + $0x188] sm:$0xff] %v999_v42  ;;  %1179 = vst [vmem:[%s2177_s7 + $0x198] sm:$0xff] %v1112_v43  ;;  %v1003_v47 = vadd.f32 %v1002_v26, %v730_v35  ;;  %v1116_v48 = vadd.f32 %v1115_v62, %v730_v35 }
 0x14e   : > { %1180 = vst [vmem:[%s2177_s7 + $0x1a0] sm:$0xff] %v1001_v46  ;;  %1182 = vst [vmem:[%s2177_s7 + $0x1b0] sm:$0xff] %v1114_v6 }
 0x14f   : > { %1181 = vst [vmem:[%s2177_s7 + $0x1a8] sm:$0xff] %v1003_v47  ;;  %1183 = vst [vmem:[%s2177_s7 + $0x1b8] sm:$0xff] %v1116_v48 }
 0x151   : > { %v1006_v16 = vpop.f32.mrb[28].mxu0  ;;  %v1119_v1 = vpop.f32.mrb[28].mxu1 }
 0x152   : > { %v1007_v9 = vadd.f32 %v1006_v16, %v735_v31  ;;  %v1120_v54 = vadd.f32 %v1119_v1, %v735_v31  ;;  %v1008_v33 = vpop.f32.mrb[29].mxu0  ;;  %v1121_v4 = vpop.f32.mrb[29].mxu1 }
 0x153   : > { %v1009_v0 = vadd.f32 %v1008_v33, %v735_v31  ;;  %v1122_v10 = vadd.f32 %v1121_v4, %v735_v31  ;;  %v1010_v50 = vpop.f32.mrb[30].mxu0  ;;  %v1123_v51 = vpop.f32.mrb[30].mxu1 }
 0x154   : > { %1184 = vst [vmem:[%s2177_s7 + $0x1c0] sm:$0xff] %v1007_v9  ;;  %1186 = vst [vmem:[%s2177_s7 + $0x1d0] sm:$0xff] %v1120_v54  ;;  %v1011_v52 = vadd.f32 %v1010_v50, %v740_v49  ;;  %v1124_v53 = vadd.f32 %v1123_v51, %v740_v49  ;;  %v1012_v55 = vpop.f32.mrb[31].mxu0  ;;  %v1125_v56 = vpop.f32.mrb[31].mxu1 }
 0x155   : > { %1185 = vst [vmem:[%s2177_s7 + $0x1c8] sm:$0xff] %v1009_v0  ;;  %1187 = vst [vmem:[%s2177_s7 + $0x1d8] sm:$0xff] %v1122_v10  ;;  %v1013_v57 = vadd.f32 %v1012_v55, %v740_v49  ;;  %v1126_v58 = vadd.f32 %v1125_v56, %v740_v49 }
 0x156   : > { %1188 = vst [vmem:[%s2177_s7 + $0x1e0] sm:$0xff] %v1011_v52  ;;  %1190 = vst [vmem:[%s2177_s7 + $0x1f0] sm:$0xff] %v1124_v53 }
 0x157   : > { %1189 = vst [vmem:[%s2177_s7 + $0x1e8] sm:$0xff] %v1013_v57  ;;  %1191 = vst [vmem:[%s2177_s7 + $0x1f8] sm:$0xff] %v1126_v58 }
 0x158 PF: > { %s15_s17 = sadd.s32 1, %s1649_s17   ;;  %s2259_s15 = smov %s1645_s16 }
 0x159   : > { %p12_p2 = scmp.ge.s32.totalorder %s15_s17, 4   ;;  %s2260_s16 = smov %s2262_s19 }
 0x15b   :  { %14 = sbr.rel (!%p12_p2) target bundleno = 2 (0x2), region = 79 }
 0x162   :  { %1222 = vsyncpa [#allocation5], 1 }
 0x163   :  { %1224 = vsyncpa [#allocation5 + $0x1], 1 }

</bundles_post_ra>
